<compile_context>
chip_gen: v7x
topology: tpu7x:2x2x1
jax: 0.10.0
libtpu: 0.0.40
codegen_flags: <defaults>
</compile_context>

<pallas_src>
import functools

import jax
import jax.numpy as jnp
from jax import lax
from jax.experimental import pallas as pl
from jax.experimental.pallas import tpu as pltpu


def _conv3x3_kernel(x_ref, w_ref, o_ref, *, wp2: int):
    """One batch element per grid step.

    x_ref: (Cin, P)  f32   zero-padded input, channels-first, spatial axis
                           flattened row-major over the (H+2, W+2) padded grid.
    w_ref: (9, Cout, Cin) bf16  per-tap weights, tap index t = ky*3 + kx.
    o_ref: (Cout, P) f32   conv result on the padded grid (interior columns valid).
    """
    P = x_ref.shape[-1]
    x = x_ref[...]                                   # (Cin, P), f32
    acc = jnp.zeros(o_ref.shape, jnp.float32)        # (Cout, P): lane-dense accumulator
    for ky in range(3):
        for kx in range(3):
            # Tap (ky, kx) reads x at flat offset q + s, s = dy*(W+2) + dx.
            s = (ky - 1) * wp2 + (kx - 1)
            if s == 0:
                xs = x
            else:
                # xs[:, q] = x[:, (q + s) % P].  For every interior output
                # column q, q + s stays inside [0, P), so the circular wrap
                # never touches the values the wrapper keeps.
                xs = pltpu.roll(x, shift=(-s) % P, axis=1)
            acc += jnp.dot(
                w_ref[ky * 3 + kx],                  # (Cout, Cin) bf16
                xs.astype(jnp.bfloat16),             # (Cin, P)   bf16
                preferred_element_type=jnp.float32,
            )
    o_ref[...] = acc.astype(o_ref.dtype)


@jax.jit
def conv2d_3x3_same(x_nchw, w_oihw):
    """x_nchw: (N, Cin, H, W) f32, w_oihw: (Cout, Cin, 3, 3) f32 -> (N, Cout, H, W) f32."""
    N, Cin, H, W = x_nchw.shape
    Cout = w_oihw.shape[0]
    Hp, Wp = H + 2, W + 2
    P = Hp * Wp

    # padding=1 + spatial flatten; stays NCHW (no activation transposes).
    x_flat = jnp.pad(x_nchw, ((0, 0), (0, 0), (1, 1), (1, 1))).reshape(N, Cin, P)
    # OIHW -> (tap, Cout, Cin), bf16 for the MXU.  In a real model this is a
    # one-time parameter re-layout, not per-call work.
    w_taps = jnp.transpose(w_oihw, (2, 3, 0, 1)).reshape(9, Cout, Cin)
    w_taps = w_taps.astype(jnp.bfloat16)

    out_flat = pl.pallas_call(
        functools.partial(_conv3x3_kernel, wp2=Wp),
        out_shape=jax.ShapeDtypeStruct((N, Cout, P), jnp.float32),
        grid_spec=pltpu.PrefetchScalarGridSpec(
            num_scalar_prefetch=0,
            grid=(N,),
            in_specs=[
                # per-batch (Cin, P) slab; batch dim squeezed out
                pl.BlockSpec((None, Cin, P), lambda n: (n, 0, 0)),
                # small weight tensor, resident across all grid steps
                pl.BlockSpec((9, Cout, Cin), lambda n: (0, 0, 0)),
            ],
            out_specs=pl.BlockSpec((None, Cout, P), lambda n: (n, 0, 0)),
        ),
        compiler_params=pltpu.CompilerParams(
            dimension_semantics=("parallel",),
        ),
    )(x_flat, w_taps)

    # Drop the padding ring of the output grid -> (N, Cout, H, W), NCHW.
    return out_flat.reshape(N, Cout, Hp, Wp)[:, :, 1:H + 1, 1:W + 1]


if __name__ == "__main__":
    key = jax.random.PRNGKey(0)
    k_x, k_w = jax.random.split(key)

    # Shapes implied by the module: x160 ~ (1, 128, 14, 14), weight ~ (32, 128, 3, 3).
    N, Cin, H, W, Cout = 1, 128, 14, 14, 32
    x = jax.random.normal(k_x, (N, Cin, H, W), dtype=jnp.float32)
    fan_in = Cin * 3 * 3
    bound = 1.0 / (fan_in ** 0.5)
    w = jax.random.uniform(k_w, (Cout, Cin, 3, 3), dtype=jnp.float32,
                           minval=-bound, maxval=bound)

    out = jax.block_until_ready(conv2d_3x3_same(x, w))
    assert out.shape == (N, Cout, H, W), out.shape

    # Reference: XLA conv on the same bf16-rounded operands (the kernel feeds
    # the MXU bf16 activations/weights with f32 accumulation).
    x_r = x.astype(jnp.bfloat16).astype(jnp.float32)
    w_r = w.astype(jnp.bfloat16).astype(jnp.float32)
    ref = lax.conv_general_dilated(
        x_r, w_r, window_strides=(1, 1), padding=((1, 1), (1, 1)),
        dimension_numbers=("NCHW", "OIHW", "NCHW"),
        precision=lax.Precision.HIGHEST)
    err = float(jnp.max(jnp.abs(out - ref)))
    assert jnp.allclose(out, ref, atol=5e-3, rtol=5e-3), f"mismatch vs lax.conv: {err}"

    print("KERNEL_OK")
</pallas_src>

<mosaic_0001>
module attributes {stable_mosaic.version = 11 : i64} {
  func.func @_conv3x3_kernel(%arg0: i32, %arg1: memref<1x128x256xf32, #tpu.memory_space<vmem>>, %arg2: memref<9x32x128xbf16, #tpu.memory_space<vmem>>, %arg3: memref<1x32x256xf32, #tpu.memory_space<vmem>>) attributes {dimension_semantics = [#tpu.dimension_semantics<parallel>], iteration_bounds = array<i64: 1>, scalar_prefetch = 0 : i64, scratch_operands = 0 : i64, tpu.core_type = #tpu.core_type<tc>, window_params = [{transform_indices = @transform_0, window_bounds = array<i64: 1, 128, 256>}, {pipeline_mode = #tpu.pipeline_mode<synchronous>, transform_indices = @transform_1, window_bounds = array<i64: 9, 32, 128>}, {transform_indices = @transform_2, window_bounds = array<i64: 1, 32, 256>}]} {
    %c0 = arith.constant 0 : index
    %c0_0 = arith.constant 0 : index
    %c0_1 = arith.constant 0 : index
    %0 = vector.load %arg1[%c0, %c0_0, %c0_1] : memref<1x128x256xf32, #tpu.memory_space<vmem>>, vector<1x128x256xf32>
    %1 = vector.shape_cast %0 : vector<1x128x256xf32> to vector<128x256xf32>
    %cst = arith.constant 0.000000e+00 : f32
    %2 = vector.broadcast %cst : f32 to vector<32x256xf32>
    %c17_i32 = arith.constant 17 : i32
    %3 = tpu.dynamic_rotate %1 by %c17_i32 dim 1 : vector<128x256xf32>, i32 -> vector<128x256xf32>
    %c0_2 = arith.constant 0 : index
    %c0_3 = arith.constant 0 : index
    %c0_4 = arith.constant 0 : index
    %4 = vector.load %arg2[%c0_2, %c0_3, %c0_4] : memref<9x32x128xbf16, #tpu.memory_space<vmem>>, vector<1x32x128xbf16>
    %5 = vector.shape_cast %4 : vector<1x32x128xbf16> to vector<32x128xbf16>
    %6 = arith.truncf %3 : vector<128x256xf32> to vector<128x256xbf16>
    %cst_5 = arith.constant dense<0.000000e+00> : vector<32x256xf32>
    %7 = tpu.matmul %5, %6, %cst_5 {dimension_numbers = #tpu.dot_dimension_numbers<[1], [0], [0], [1], [0, 0, 1, 1], [], []>} : vector<32x128xbf16>, vector<128x256xbf16>, vector<32x256xf32> -> vector<32x256xf32>
    %8 = arith.addf %2, %7 : vector<32x256xf32>
    %c16_i32 = arith.constant 16 : i32
    %9 = tpu.dynamic_rotate %1 by %c16_i32 dim 1 : vector<128x256xf32>, i32 -> vector<128x256xf32>
    %c1 = arith.constant 1 : index
    %c0_6 = arith.constant 0 : index
    %c0_7 = arith.constant 0 : index
    %10 = vector.load %arg2[%c1, %c0_6, %c0_7] : memref<9x32x128xbf16, #tpu.memory_space<vmem>>, vector<1x32x128xbf16>
    %11 = vector.shape_cast %10 : vector<1x32x128xbf16> to vector<32x128xbf16>
    %12 = arith.truncf %9 : vector<128x256xf32> to vector<128x256xbf16>
    %cst_8 = arith.constant dense<0.000000e+00> : vector<32x256xf32>
    %13 = tpu.matmul %11, %12, %cst_8 {dimension_numbers = #tpu.dot_dimension_numbers<[1], [0], [0], [1], [0, 0, 1, 1], [], []>} : vector<32x128xbf16>, vector<128x256xbf16>, vector<32x256xf32> -> vector<32x256xf32>
    %14 = arith.addf %8, %13 : vector<32x256xf32>
    %c15_i32 = arith.constant 15 : i32
    %15 = tpu.dynamic_rotate %1 by %c15_i32 dim 1 : vector<128x256xf32>, i32 -> vector<128x256xf32>
    %c2 = arith.constant 2 : index
    %c0_9 = arith.constant 0 : index
    %c0_10 = arith.constant 0 : index
    %16 = vector.load %arg2[%c2, %c0_9, %c0_10] : memref<9x32x128xbf16, #tpu.memory_space<vmem>>, vector<1x32x128xbf16>
    %17 = vector.shape_cast %16 : vector<1x32x128xbf16> to vector<32x128xbf16>
    %18 = arith.truncf %15 : vector<128x256xf32> to vector<128x256xbf16>
    %cst_11 = arith.constant dense<0.000000e+00> : vector<32x256xf32>
    %19 = tpu.matmul %17, %18, %cst_11 {dimension_numbers = #tpu.dot_dimension_numbers<[1], [0], [0], [1], [0, 0, 1, 1], [], []>} : vector<32x128xbf16>, vector<128x256xbf16>, vector<32x256xf32> -> vector<32x256xf32>
    %20 = arith.addf %14, %19 : vector<32x256xf32>
    %c1_i32 = arith.constant 1 : i32
    %21 = tpu.dynamic_rotate %1 by %c1_i32 dim 1 : vector<128x256xf32>, i32 -> vector<128x256xf32>
    %c3 = arith.constant 3 : index
    %c0_12 = arith.constant 0 : index
    %c0_13 = arith.constant 0 : index
    %22 = vector.load %arg2[%c3, %c0_12, %c0_13] : memref<9x32x128xbf16, #tpu.memory_space<vmem>>, vector<1x32x128xbf16>
    %23 = vector.shape_cast %22 : vector<1x32x128xbf16> to vector<32x128xbf16>
    %24 = arith.truncf %21 : vector<128x256xf32> to vector<128x256xbf16>
    %cst_14 = arith.constant dense<0.000000e+00> : vector<32x256xf32>
    %25 = tpu.matmul %23, %24, %cst_14 {dimension_numbers = #tpu.dot_dimension_numbers<[1], [0], [0], [1], [0, 0, 1, 1], [], []>} : vector<32x128xbf16>, vector<128x256xbf16>, vector<32x256xf32> -> vector<32x256xf32>
    %26 = arith.addf %20, %25 : vector<32x256xf32>
    %c4 = arith.constant 4 : index
    %c0_15 = arith.constant 0 : index
    %c0_16 = arith.constant 0 : index
    %27 = vector.load %arg2[%c4, %c0_15, %c0_16] : memref<9x32x128xbf16, #tpu.memory_space<vmem>>, vector<1x32x128xbf16>
    %28 = vector.shape_cast %27 : vector<1x32x128xbf16> to vector<32x128xbf16>
    %29 = arith.truncf %1 : vector<128x256xf32> to vector<128x256xbf16>
    %cst_17 = arith.constant dense<0.000000e+00> : vector<32x256xf32>
    %30 = tpu.matmul %28, %29, %cst_17 {dimension_numbers = #tpu.dot_dimension_numbers<[1], [0], [0], [1], [0, 0, 1, 1], [], []>} : vector<32x128xbf16>, vector<128x256xbf16>, vector<32x256xf32> -> vector<32x256xf32>
    %31 = arith.addf %26, %30 : vector<32x256xf32>
    %c255_i32 = arith.constant 255 : i32
    %32 = tpu.dynamic_rotate %1 by %c255_i32 dim 1 : vector<128x256xf32>, i32 -> vector<128x256xf32>
    %c5 = arith.constant 5 : index
    %c0_18 = arith.constant 0 : index
    %c0_19 = arith.constant 0 : index
    %33 = vector.load %arg2[%c5, %c0_18, %c0_19] : memref<9x32x128xbf16, #tpu.memory_space<vmem>>, vector<1x32x128xbf16>
    %34 = vector.shape_cast %33 : vector<1x32x128xbf16> to vector<32x128xbf16>
    %35 = arith.truncf %32 : vector<128x256xf32> to vector<128x256xbf16>
    %cst_20 = arith.constant dense<0.000000e+00> : vector<32x256xf32>
    %36 = tpu.matmul %34, %35, %cst_20 {dimension_numbers = #tpu.dot_dimension_numbers<[1], [0], [0], [1], [0, 0, 1, 1], [], []>} : vector<32x128xbf16>, vector<128x256xbf16>, vector<32x256xf32> -> vector<32x256xf32>
    %37 = arith.addf %31, %36 : vector<32x256xf32>
    %c241_i32 = arith.constant 241 : i32
    %38 = tpu.dynamic_rotate %1 by %c241_i32 dim 1 : vector<128x256xf32>, i32 -> vector<128x256xf32>
    %c6 = arith.constant 6 : index
    %c0_21 = arith.constant 0 : index
    %c0_22 = arith.constant 0 : index
    %39 = vector.load %arg2[%c6, %c0_21, %c0_22] : memref<9x32x128xbf16, #tpu.memory_space<vmem>>, vector<1x32x128xbf16>
    %40 = vector.shape_cast %39 : vector<1x32x128xbf16> to vector<32x128xbf16>
    %41 = arith.truncf %38 : vector<128x256xf32> to vector<128x256xbf16>
    %cst_23 = arith.constant dense<0.000000e+00> : vector<32x256xf32>
    %42 = tpu.matmul %40, %41, %cst_23 {dimension_numbers = #tpu.dot_dimension_numbers<[1], [0], [0], [1], [0, 0, 1, 1], [], []>} : vector<32x128xbf16>, vector<128x256xbf16>, vector<32x256xf32> -> vector<32x256xf32>
    %43 = arith.addf %37, %42 : vector<32x256xf32>
    %c240_i32 = arith.constant 240 : i32
    %44 = tpu.dynamic_rotate %1 by %c240_i32 dim 1 : vector<128x256xf32>, i32 -> vector<128x256xf32>
    %c7 = arith.constant 7 : index
    %c0_24 = arith.constant 0 : index
    %c0_25 = arith.constant 0 : index
    %45 = vector.load %arg2[%c7, %c0_24, %c0_25] : memref<9x32x128xbf16, #tpu.memory_space<vmem>>, vector<1x32x128xbf16>
    %46 = vector.shape_cast %45 : vector<1x32x128xbf16> to vector<32x128xbf16>
    %47 = arith.truncf %44 : vector<128x256xf32> to vector<128x256xbf16>
    %cst_26 = arith.constant dense<0.000000e+00> : vector<32x256xf32>
    %48 = tpu.matmul %46, %47, %cst_26 {dimension_numbers = #tpu.dot_dimension_numbers<[1], [0], [0], [1], [0, 0, 1, 1], [], []>} : vector<32x128xbf16>, vector<128x256xbf16>, vector<32x256xf32> -> vector<32x256xf32>
    %49 = arith.addf %43, %48 : vector<32x256xf32>
    %c239_i32 = arith.constant 239 : i32
    %50 = tpu.dynamic_rotate %1 by %c239_i32 dim 1 : vector<128x256xf32>, i32 -> vector<128x256xf32>
    %c8 = arith.constant 8 : index
    %c0_27 = arith.constant 0 : index
    %c0_28 = arith.constant 0 : index
    %51 = vector.load %arg2[%c8, %c0_27, %c0_28] : memref<9x32x128xbf16, #tpu.memory_space<vmem>>, vector<1x32x128xbf16>
    %52 = vector.shape_cast %51 : vector<1x32x128xbf16> to vector<32x128xbf16>
    %53 = arith.truncf %50 : vector<128x256xf32> to vector<128x256xbf16>
    %cst_29 = arith.constant dense<0.000000e+00> : vector<32x256xf32>
    %54 = tpu.matmul %52, %53, %cst_29 {dimension_numbers = #tpu.dot_dimension_numbers<[1], [0], [0], [1], [0, 0, 1, 1], [], []>} : vector<32x128xbf16>, vector<128x256xbf16>, vector<32x256xf32> -> vector<32x256xf32>
    %55 = arith.addf %49, %54 : vector<32x256xf32>
    %c0_30 = arith.constant 0 : index
    %c0_31 = arith.constant 0 : index
    %c0_32 = arith.constant 0 : index
    %56 = vector.load %arg3[%c0_30, %c0_31, %c0_32] : memref<1x32x256xf32, #tpu.memory_space<vmem>>, vector<1x32x256xf32>
    %57 = vector.shape_cast %56 : vector<1x32x256xf32> to vector<32x256xf32>
    %58 = vector.shape_cast %55 : vector<32x256xf32> to vector<1x32x256xf32>
    tpu.vector_store %arg3[%c0_30, %c0_31, %c0_32], %58 {strides = array<i32>} : memref<1x32x256xf32, #tpu.memory_space<vmem>>, vector<1x32x256xf32>,
    return
  }
  func.func @transform_0(%arg0: i32) -> (i32, i32, i32) {
    %c0_i32 = arith.constant 0 : i32
    %c0_i32_0 = arith.constant 0 : i32
    %c0_i32_1 = arith.constant 0 : i32
    return %arg0, %c0_i32, %c0_i32_0 : i32, i32, i32
  }
  func.func @transform_1(%arg0: i32) -> (i32, i32, i32) {
    %c0_i32 = arith.constant 0 : i32
    %c0_i32_0 = arith.constant 0 : i32
    %c0_i32_1 = arith.constant 0 : i32
    %c0_i32_2 = arith.constant 0 : i32
    return %c0_i32, %c0_i32_0, %c0_i32_1 : i32, i32, i32
  }
  func.func @transform_2(%arg0: i32) -> (i32, i32, i32) {
    %c0_i32 = arith.constant 0 : i32
    %c0_i32_0 = arith.constant 0 : i32
    %c0_i32_1 = arith.constant 0 : i32
    return %arg0, %c0_i32, %c0_i32_0 : i32, i32, i32
  }
}

</mosaic_0001>

<bundles_post_ra>
// kernel: conv2d_3x3_same.1
= control target key start
LH: loop header
LB: loop body
LE: loop exit
PB: predicated region body
PF: predicated region fallthrough
CT: control target
= control target key end

     0   :  { %s2492_s25 = smov 17   ;;  %s2493_s19 = smov 16   ;;  %s3847_s0 = inlined_call_operand.vmem [shape: f32[1,128,256], index: 0, kind: input, shape index: {}]   ;;  %s3848_s1 = inlined_call_operand.vmem [shape: bf16[9,32,128], index: 1, kind: input, shape index: {}]   ;;  %s3849_s2 = inlined_call_operand.vmem [shape: f32[1,32,256], index: 2, kind: output, shape index: {}]  }
   0x1   :  { %v2519_v0 = vld [vmem:[%s3847_s0 + $0x40] sm:$0xff]  ;;  %v2524_v1 = vld [vmem:[%s3847_s0 + $0x50] sm:$0xff]  ;;  %v17_v24 = vld [vmem:[%s3847_s0 + $0x28] sm:$0xff]  ;;  %s2495_s21 = smov 127   ;;  %s2496_s24 = smov 15  }
   0x2   :  { %v2529_v2 = vld [vmem:[%s3847_s0] sm:$0xff]  ;;  %v2533_v3 = vpack.i.bf16 %v2524_v1, %v2519_v0  ;;  %v14_v4 = vld [vmem:[%s3847_s0 + $0x10] sm:$0xff]  ;;  %v19_v25 = vld [vmem:[%s3847_s0 + $0x38] sm:$0xff]  ;;  %v802_v54 = vpack.c.bf16 %v2524_v1, %v2519_v0  ;;  %s2497_s26 = smov 113   ;;  %s2498_s27 = smov 1  }
   0x3   :  { %v2541_v5 = vld [vmem:[%s3847_s0 + $0x60] sm:$0xff]  ;;  %v2546_v6 = vld [vmem:[%s3847_s0 + $0x70] sm:$0xff]  ;;  %v2549_v7 = vpack.i.bf16 %v14_v4, %v2529_v2  ;;  %v13_v26 = vld [vmem:[%s3847_s0 + $0x8] sm:$0xff]  ;;  %v2651_v28 = vpack.i.bf16 %v19_v25, %v17_v24  ;;  %v798_v48 = vpack.c.bf16 %v14_v4, %v2529_v2  ;;  %v801_v50 = vpack.c.bf16 %v19_v25, %v17_v24  ;;  %s2499_s28 = smov 112  }
   0x4   :  { %v2554_v8 = vld [vmem:[%s3847_s0 + $0x20] sm:$0xff]  ;;  %v2559_v9 = vld [vmem:[%s3847_s0 + $0x30] sm:$0xff]  ;;  %1813 = vrot.lane.b32.xlu1 %v2533_v3, %s2492_s25  ;;  %v2565_v10 = vpack.i.bf16 %v2546_v6, %v2541_v5  ;;  %v15_v27 = vld [vmem:[%s3847_s0 + $0x18] sm:$0xff]  ;;  %v1892_v55 = vpack.i.bf16 %v13_v26, %v2519_v0  ;;  %v1902_v57 = vpack.i.bf16 %v2524_v1, %v19_v25  ;;  %v804_v58 = vpack.c.bf16 %v2546_v6, %v2541_v5 }
   0x5   :  { %1803 = vrot.lane.b32.xlu0 %v2549_v7, %s2492_s25  ;;  %v2571_v11 = vpack.i.bf16 %v2559_v9, %v2554_v8  ;;  %v2576_v12 = vld [vmem:[%s3847_s0 + $0xa0] sm:$0xff]  ;;  %v2581_v13 = vld [vmem:[%s3847_s0 + $0xb0] sm:$0xff]  ;;  %v2655_v29 = vpack.i.bf16 %v15_v27, %v13_v26  ;;  %v25_v30 = vld [vmem:[%s3847_s0 + $0x68] sm:$0xff]  ;;  %v799_v46 = vpack.c.bf16 %v15_v27, %v13_v26  ;;  %v800_v51 = vpack.c.bf16 %v2559_v9, %v2554_v8 }
   0x6   :  { %v2586_v14 = vld [vmem:[%s3847_s0 + $0x80] sm:$0xff]  ;;  %v2591_v15 = vld [vmem:[%s3847_s0 + $0x90] sm:$0xff]  ;;  %v2597_v16 = vpack.i.bf16 %v2581_v13, %v2576_v12  ;;  %v27_v31 = vld [vmem:[%s3847_s0 + $0x78] sm:$0xff]  ;;  %v1897_v53 = vpack.i.bf16 %v17_v24, %v15_v27  ;;  %v808_v62 = vpack.c.bf16 %v2581_v13, %v2576_v12  ;;  %v2494_v5 = vmov 0  }
   0x7   :  { %v2603_v17 = vpack.i.bf16 %v2591_v15, %v2586_v14  ;;  %v2608_v18 = vld [vmem:[%s3847_s0 + $0xe0] sm:$0xff]  ;;  %v2613_v19 = vld [vmem:[%s3847_s0 + $0xf0] sm:$0xff]  ;;  %v21_v32 = vld [vmem:[%s3847_s0 + $0x48] sm:$0xff]  ;;  %v2671_v34 = vpack.i.bf16 %v27_v31, %v25_v30  ;;  %826 = vmatprep.subr.bf16.mxu0 %v799_v46  ;;  %v805_v56 = vpack.c.bf16 %v27_v31, %v25_v30  ;;  %v806_v60 = vpack.c.bf16 %v2591_v15, %v2586_v14 }
   0x8   :  { %1818 = vrot.lane.b32.xlu1 %v2565_v10, %s2492_s25  ;;  %v2618_v20 = vld [vmem:[%s3847_s0 + $0xc0] sm:$0xff]  ;;  %v2623_v21 = vld [vmem:[%s3847_s0 + $0xd0] sm:$0xff]  ;;  %v2629_v22 = vpack.i.bf16 %v2613_v19, %v2608_v18  ;;  %v23_v33 = vld [vmem:[%s3847_s0 + $0x58] sm:$0xff]  ;;  %827 = vmatpush1.bf16.msra.mxu0 %v798_v48  ;;  %v812_v2 = vpack.c.bf16 %v2613_v19, %v2608_v18  ;;  %v108_v26 = vlaneseq }
   0x9   :  { %1808 = vrot.lane.b32.xlu0 %v2571_v11, %s2492_s25  ;;  %v2635_v23 = vpack.i.bf16 %v2623_v21, %v2618_v20  ;;  %v2675_v35 = vpack.i.bf16 %v23_v33, %v21_v32  ;;  %v33_v36 = vld [vmem:[%s3847_s0 + $0xa8] sm:$0xff]  ;;  %v35_v37 = vld [vmem:[%s3847_s0 + $0xb8] sm:$0xff]  ;;  %828 = vmatprep.subr.bf16.mxu0 %v801_v50  ;;  %v803_v52 = vpack.c.bf16 %v23_v33, %v21_v32  ;;  %v2442_v4 = vld [vmem:[%s3848_s1 + $0x40] sm:$0xff]  }
   0xa   :  { %v29_v38 = vld [vmem:[%s3847_s0 + $0x88] sm:$0xff]  ;;  %v31_v39 = vld [vmem:[%s3847_s0 + $0x98] sm:$0xff]  ;;  %v2691_v40 = vpack.i.bf16 %v35_v37, %v33_v36  ;;  %v809_v61 = vpack.c.bf16 %v35_v37, %v33_v36  ;;  %v810_v0 = vpack.c.bf16 %v2623_v21, %v2618_v20  ;;  %858 = vmatprep.mubr.bf16.mxu0 %v2494_v5  ;;  %325 = vmatprep.mubr.bf16.mxu1 %v2494_v5  ;;  %v2869_v31 = vand.u32 127, %v108_v26 }
   0xb   :  { %v2695_v41 = vpack.i.bf16 %v31_v39, %v29_v38  ;;  %v41_v42 = vld [vmem:[%s3847_s0 + $0xe8] sm:$0xff]  ;;  %v43_v43 = vld [vmem:[%s3847_s0 + $0xf8] sm:$0xff]  ;;  %v807_v59 = vpack.c.bf16 %v31_v39, %v29_v38 }
   0xc   :  { %1828 = vrot.lane.b32.xlu1 %v2597_v16, %s2492_s25  ;;  %v37_v44 = vld [vmem:[%s3847_s0 + $0xc8] sm:$0xff]  ;;  %v39_v45 = vld [vmem:[%s3847_s0 + $0xd8] sm:$0xff]  ;;  %v2711_v47 = vpack.i.bf16 %v43_v43, %v41_v42  ;;  %829 = vmatpush1.bf16.msra.mxu0 %v800_v51  ;;  %v813_v1 = vpack.c.bf16 %v43_v43, %v41_v42  ;;  %vm227_vm0 = vcmp.lt.s32.totalorder %v2869_v31, 16  ;;  %vm110_vm1 = vcmp.lt.s32.totalorder %v2869_v31, 17 }
   0xd   :  { %1823 = vrot.lane.b32.xlu0 %v2603_v17, %s2492_s25  ;;  %v2716_v49 = vpack.i.bf16 %v39_v45, %v37_v44  ;;  %830 = vmatprep.subr.bf16.mxu0 %v803_v52  ;;  %v811_v63 = vpack.c.bf16 %v39_v45, %v37_v44  ;;  %v2445_v6 = vld [vmem:[%s3848_s1 + $0x48] sm:$0xff]   ;;  %vm951_vm2 = vcmp.lt.s32.totalorder %v2869_v31, 127  ;;  %vm475_vm3 = vcmp.lt.s32.totalorder %v2869_v31, 15 }
   0xe   :  { %vm1142_vm4 = vcmp.lt.s32.totalorder %v2869_v31, 113  ;;  %vm666_vm5 = vcmp.lt.s32.totalorder %v2869_v31, 1  ;;  %vm1333_vm6 = vcmp.lt.s32.totalorder %v2869_v31, 112  ;;  %vm1524_vm7 = vcmp.lt.s32.totalorder %v2869_v31, 111 }
  0x10   :  { %1838 = vrot.lane.b32.xlu1 %v2629_v22, %s2492_s25  ;;  %831 = vmatpush1.bf16.msra.mxu0 %v802_v54 }
  0x11   :  { %1833 = vrot.lane.b32.xlu0 %v2635_v23, %s2492_s25  ;;  %832 = vmatprep.subr.bf16.mxu0 %v805_v56 }
  0x14   :  { %1848 = vrot.lane.b32.xlu1 %v2651_v28, %s2492_s25  ;;  %833 = vmatpush1.bf16.msra.mxu0 %v804_v58 }
  0x15   :  { %1843 = vrot.lane.b32.xlu0 %v2655_v29, %s2492_s25  ;;  %834 = vmatprep.subr.bf16.mxu0 %v807_v59 }
  0x18   :  { %1858 = vrot.lane.b32.xlu1 %v2671_v34, %s2492_s25  ;;  %835 = vmatpush1.bf16.msra.mxu0 %v806_v60 }
  0x19   :  { %1853 = vrot.lane.b32.xlu0 %v2675_v35, %s2492_s25  ;;  %836 = vmatprep.subr.bf16.mxu0 %v809_v61 }
  0x1c   :  { %1868 = vrot.lane.b32.xlu1 %v2691_v40, %s2492_s25  ;;  %837 = vmatpush1.bf16.msra.mxu0 %v808_v62 }
  0x1d   :  { %1863 = vrot.lane.b32.xlu0 %v2695_v41, %s2492_s25  ;;  %838 = vmatprep.subr.bf16.mxu0 %v811_v63 }
  0x20   :  { %1878 = vrot.lane.b32.xlu1 %v2711_v47, %s2492_s25  ;;  %839 = vmatpush1.bf16.msra.mxu0 %v810_v0 }
  0x21   :  { %1873 = vrot.lane.b32.xlu0 %v2716_v49, %s2492_s25  ;;  %840 = vmatprep.subr.bf16.mxu0 %v813_v1 }
  0x24   :  { %1888 = vrot.lane.b32.xlu1 %v2571_v11, %s2493_s19  ;;  %841 = vmatpush1.bf16.msra.mxu0 %v812_v2 }
  0x25   :  { %1883 = vrot.lane.b32.xlu0 %v2549_v7, %s2493_s19 }
  0x27   :  { %859 = vmatmul.mubr.bf16.vlgmr.msra.gmra.mrb[0].mxu0 %v2442_v4 }
  0x28   :  { %1898 = vrot.lane.b32.xlu1 %v1897_v53, %s2493_s19  ;;  %868 = vmatprep.mubr.bf16.mxu0 %v2494_v5 }
  0x29   :  { %1893 = vrot.lane.b32.xlu0 %v1892_v55, %s2493_s19 }
  0x2c   :  { %1908 = vrot.lane.b32.xlu1 %v2675_v35, %s2493_s19 }
  0x2d   :  { %1903 = vrot.lane.b32.xlu0 %v1902_v57, %s2493_s19 }
  0x2f   :  { %869 = vmatmul.mubr.bf16.gmra.mrb[4].mxu0 %v2445_v6 }
  0x30   :  { %1918 = vrot.lane.b32.xlu1 %v2671_v34, %s2493_s19  ;;  %1049 = vmatprep.mubr.bf16.mxu0 %v2494_v5 }
  0x31   :  { %1913 = vrot.lane.b32.xlu0 %v2565_v10, %s2493_s19 }
  0x34   :  { %1928 = vrot.lane.b32.xlu1 %v2695_v41, %s2493_s19 }
  0x35   :  { %1923 = vrot.lane.b32.xlu0 %v2603_v17, %s2493_s19 }
  0x38   :  { %1938 = vrot.lane.b32.xlu1 %v2691_v40, %s2493_s19 }
  0x39   :  { %1933 = vrot.lane.b32.xlu0 %v2597_v16, %s2493_s19 }
  0x3c   :  { %1948 = vrot.lane.b32.xlu1 %v2716_v49, %s2493_s19 }
  0x3d   :  { %1943 = vrot.lane.b32.xlu0 %v2635_v23, %s2493_s19 }
  0x40   :  { %1958 = vrot.lane.b32.xlu1 %v2711_v47, %s2493_s19 }
  0x41   :  { %1953 = vrot.lane.b32.xlu0 %v2629_v22, %s2493_s19 }
  0x44   :  { %1968 = vrot.lane.b32.xlu1 %v2655_v29, %s2495_s21 }
  0x45   :  { %1963 = vrot.lane.b32.xlu0 %v2549_v7, %s2495_s21 }
  0x48   :  { %1978 = vrot.lane.b32.xlu1 %v2651_v28, %s2495_s21 }
  0x49   :  { %1973 = vrot.lane.b32.xlu0 %v2571_v11, %s2495_s21 }
  0x4c   :  { %1988 = vrot.lane.b32.xlu1 %v2675_v35, %s2495_s21 }
  0x4d   :  { %1983 = vrot.lane.b32.xlu0 %v2533_v3, %s2495_s21 }
  0x50   :  { %1998 = vrot.lane.b32.xlu1 %v2671_v34, %s2495_s21 }
  0x51   :  { %1993 = vrot.lane.b32.xlu0 %v2565_v10, %s2495_s21 }
  0x54   :  { %2008 = vrot.lane.b32.xlu1 %v2695_v41, %s2495_s21 }
  0x55   :  { %2003 = vrot.lane.b32.xlu0 %v2603_v17, %s2495_s21 }
  0x58   :  { %2018 = vrot.lane.b32.xlu1 %v2691_v40, %s2495_s21 }
  0x59   :  { %2013 = vrot.lane.b32.xlu0 %v2597_v16, %s2495_s21 }
  0x5c   :  { %2028 = vrot.lane.b32.xlu1 %v2716_v49, %s2495_s21 }
  0x5d   :  { %2023 = vrot.lane.b32.xlu0 %v2635_v23, %s2495_s21 }
  0x60   :  { %2038 = vrot.lane.b32.xlu1 %v2711_v47, %s2495_s21 }
  0x61   :  { %2033 = vrot.lane.b32.xlu0 %v2629_v22, %s2495_s21 }
  0x64   :  { %2048 = vrot.lane.b32.xlu1 %v2655_v29, %s2496_s24 }
  0x65   :  { %2043 = vrot.lane.b32.xlu0 %v2549_v7, %s2496_s24 }
  0x68   :  { %2058 = vrot.lane.b32.xlu1 %v2655_v29, %s2497_s26 }
  0x69   :  { %2053 = vrot.lane.b32.xlu0 %v2549_v7, %s2497_s26 }
  0x6c   :  { %2068 = vrot.lane.b32.xlu1 %v2651_v28, %s2496_s24 }
  0x6d   :  { %2063 = vrot.lane.b32.xlu0 %v2571_v11, %s2496_s24 }
  0x70   :  { %2078 = vrot.lane.b32.xlu1 %v2651_v28, %s2497_s26 }
  0x71   :  { %2073 = vrot.lane.b32.xlu0 %v2571_v11, %s2497_s26 }
  0x74   :  { %2088 = vrot.lane.b32.xlu1 %v2675_v35, %s2496_s24 }
  0x75   :  { %2083 = vrot.lane.b32.xlu0 %v2533_v3, %s2496_s24 }
  0x76   :  { %v2813_v8 = vpop.permute.xlu1 %1813 }
  0x77   :  { %v2815_v9 = vpop.permute.xlu0 %1803  ;;  %v1816_v0 = vunpack.i.h.bf16 %v2813_v8 }
  0x78   :  { %2098 = vrot.lane.b32.xlu1 %v2675_v35, %s2497_s26 }
  0x79   :  { %2093 = vrot.lane.b32.xlu0 %v2533_v3, %s2497_s26 }
  0x7a   :  { %v2821_v12 = vpop.permute.xlu1 %1818 }
  0x7b   :  { %v2823_v13 = vpop.permute.xlu0 %1808 }
  0x7c   :  { %2108 = vrot.lane.b32.xlu1 %v2671_v34, %s2496_s24 }
  0x7d   :  { %2103 = vrot.lane.b32.xlu0 %v2565_v10, %s2496_s24 }
  0x7e   :  { %v2829_v14 = vpop.permute.xlu1 %1828 }
  0x7f   :  { %v2831_v15 = vpop.permute.xlu0 %1823 }
  0x80   :  { %2118 = vrot.lane.b32.xlu1 %v2671_v34, %s2497_s26 }
  0x81   :  { %2113 = vrot.lane.b32.xlu0 %v2565_v10, %s2497_s26 }
  0x82   :  { %v2837_v18 = vpop.permute.xlu1 %1838 }
  0x83   :  { %v2839_v19 = vpop.permute.xlu0 %1833 }
  0x84   :  { %2128 = vrot.lane.b32.xlu1 %v2695_v41, %s2496_s24 }
  0x85   :  { %2123 = vrot.lane.b32.xlu0 %v2603_v17, %s2496_s24 }
  0x86   :  { %v2845_v20 = vpop.permute.xlu1 %1848 }
  0x87   :  { %v2847_v21 = vpop.permute.xlu0 %1843 }
  0x88   :  { %2138 = vrot.lane.b32.xlu1 %v2695_v41, %s2497_s26 }
  0x89   :  { %2133 = vrot.lane.b32.xlu0 %v2603_v17, %s2497_s26 }
  0x8a   :  { %v2853_v24 = vpop.permute.xlu1 %1858 }
  0x8b   :  { %v2855_v25 = vpop.permute.xlu0 %1853 }
  0x8c   :  { %2148 = vrot.lane.b32.xlu1 %v2691_v40, %s2496_s24 }
  0x8d   :  { %2143 = vrot.lane.b32.xlu0 %v2597_v16, %s2496_s24 }
  0x8e   :  { %v2861_v27 = vpop.permute.xlu1 %1868 }
  0x8f   :  { %v2863_v30 = vpop.permute.xlu0 %1863 }
  0x90   :  { %2158 = vrot.lane.b32.xlu1 %v2691_v40, %s2497_s26 }
  0x91   :  { %2153 = vrot.lane.b32.xlu0 %v2597_v16, %s2497_s26 }
  0x92   :  { %v2871_v32 = vpop.permute.xlu1 %1878 }
  0x93   :  { %v2873_v33 = vpop.permute.xlu0 %1873 }
  0x94   :  { %2168 = vrot.lane.b32.xlu1 %v2716_v49, %s2496_s24 }
  0x95   :  { %2163 = vrot.lane.b32.xlu0 %v2635_v23, %s2496_s24 }
  0x96   :  { %v1889_v36 = vpop.permute.xlu1 %1888 }
  0x97   :  { %v1884_v37 = vpop.permute.xlu0 %1883  ;;  %v1890_v51 = vunpack.i.l.bf16 %v1889_v36  ;;  %v1891_v60 = vunpack.i.h.bf16 %v1889_v36 }
  0x98   :  { %2178 = vrot.lane.b32.xlu1 %v2716_v49, %s2497_s26  ;;  %v1886_v39 = vunpack.i.h.bf16 %v1884_v37  ;;  %v1885_v44 = vunpack.i.l.bf16 %v1884_v37 }
  0x99   :  { %2173 = vrot.lane.b32.xlu0 %v2635_v23, %s2497_s26 }
  0x9a   :  { %v1899_v38 = vpop.permute.xlu1 %1898 }
  0x9b   :  { %v1900_v42 = vunpack.i.l.bf16 %v1899_v38  ;;  %v1894_v43 = vpop.permute.xlu0 %1893  ;;  %v1901_v46 = vunpack.i.h.bf16 %v1899_v38 }
  0x9c   :  { %v1896_v45 = vunpack.i.h.bf16 %v1894_v43  ;;  %2188 = vrot.lane.b32.xlu1 %v2711_v47, %s2496_s24  ;;  %v1895_v61 = vunpack.i.l.bf16 %v1894_v43 }
  0x9d   :  { %2183 = vrot.lane.b32.xlu0 %v2629_v22, %s2496_s24  ;;  %v229_v48 = vsel %vm227_vm0, %v1886_v39, %v1900_v42  ;;  %v245_v50 = vsel %vm227_vm0, %v1900_v42, %v1886_v39  ;;  %v230_v1 = vsel %vm227_vm0, %v1890_v51, %v1901_v46  ;;  %v246_v2 = vsel %vm227_vm0, %v1901_v46, %v1890_v51 }
  0x9e   :  { %v1909_v52 = vpop.permute.xlu1 %1908  ;;  %v228_v53 = vsel %vm227_vm0, %v1885_v44, %v1896_v45  ;;  %v244_v54 = vsel %vm227_vm0, %v1896_v45, %v1885_v44  ;;  %v1815_v44 = vunpack.i.l.bf16 %v2813_v8  ;;  %v1806_v45 = vunpack.i.h.bf16 %v2815_v9 }
  0x9f   :  { %v1911_v55 = vunpack.i.h.bf16 %v1909_v52  ;;  %v1910_v56 = vunpack.i.l.bf16 %v1909_v52  ;;  %v1904_v57 = vpop.permute.xlu0 %1903  ;;  %v266_v58 = vpack.c.bf16 %v229_v48, %v228_v53  ;;  %v265_v59 = vpack.c.bf16 %v245_v50, %v244_v54 }
  0xa0   :  { %v1906_v62 = vunpack.i.h.bf16 %v1904_v57  ;;  %v1905_v63 = vunpack.i.l.bf16 %v1904_v57  ;;  %2198 = vrot.lane.b32.xlu1 %v2711_v47, %s2497_s26  ;;  %v1805_v50 = vunpack.i.l.bf16 %v2815_v9  ;;  %v1821_v54 = vunpack.i.h.bf16 %v2821_v12 }
  0xa1   :  { %2193 = vrot.lane.b32.xlu0 %v2629_v22, %s2497_s26  ;;  %293 = vmatprep.subr.bf16.mxu1 %v266_v58  ;;  %v232_v36 = vsel %vm227_vm0, %v1895_v61, %v1910_v56  ;;  %v248_v52 = vsel %vm227_vm0, %v1910_v56, %v1895_v61  ;;  %v1820_v57 = vunpack.i.l.bf16 %v2821_v12  ;;  %v1861_v9 = vunpack.i.h.bf16 %v2853_v24 }
  0xa2   :  { %294 = vmatpush1.bf16.msra.mxu1 %v265_v59  ;;  %v1919_v4 = vpop.permute.xlu1 %1918  ;;  %v231_v6 = vsel %vm227_vm0, %v1891_v60, %v1905_v63  ;;  %v247_v26 = vsel %vm227_vm0, %v1905_v63, %v1891_v60  ;;  %v233_v22 = vsel %vm227_vm0, %v1906_v62, %v1911_v55  ;;  %v249_v53 = vsel %vm227_vm0, %v1911_v55, %v1906_v62 }
  0xa3   :  { %v1921_v37 = vunpack.i.h.bf16 %v1919_v4  ;;  %v1920_v38 = vunpack.i.l.bf16 %v1919_v4  ;;  %v1914_v39 = vpop.permute.xlu0 %1913  ;;  %v268_v42 = vpack.c.bf16 %v231_v6, %v230_v1  ;;  %v267_v43 = vpack.c.bf16 %v247_v26, %v246_v2 }
  0xa4   :  { %v1916_v46 = vunpack.i.h.bf16 %v1914_v39  ;;  %v1915_v48 = vunpack.i.l.bf16 %v1914_v39  ;;  %2208 = vrot.lane.b32.xlu1 %v2655_v29, %s2498_s27  ;;  %v270_v51 = vpack.c.bf16 %v233_v22, %v232_v36  ;;  %v1811_v63 = vunpack.i.h.bf16 %v2823_v13 }
  0xa5   :  { %2203 = vrot.lane.b32.xlu0 %v2549_v7, %s2498_s27  ;;  %295 = vmatprep.subr.bf16.mxu1 %v268_v42  ;;  %v1810_v1 = vunpack.i.l.bf16 %v2823_v13  ;;  %v1850_v55 = vunpack.i.l.bf16 %v2845_v20  ;;  %v269_v6 = vpack.c.bf16 %v249_v53, %v248_v52  ;;  %v1851_v26 = vunpack.i.h.bf16 %v2845_v20 }
  0xa6   :  { %296 = vmatpush1.bf16.msra.mxu1 %v267_v43  ;;  %v1929_v58 = vpop.permute.xlu1 %1928  ;;  %v234_v59 = vsel %vm227_vm0, %v1915_v48, %v1920_v38  ;;  %v235_v60 = vsel %vm227_vm0, %v1916_v46, %v1921_v37  ;;  %v250_v13 = vsel %vm227_vm0, %v1920_v38, %v1915_v48  ;;  %v251_v22 = vsel %vm227_vm0, %v1921_v37, %v1916_v46 }
  0xa7   :  { %v1931_v56 = vunpack.i.h.bf16 %v1929_v58  ;;  %v1930_v61 = vunpack.i.l.bf16 %v1929_v58  ;;  %v1924_v2 = vpop.permute.xlu0 %1923  ;;  %297 = vmatprep.subr.bf16.mxu1 %v270_v51  ;;  %v272_v36 = vpack.c.bf16 %v235_v60, %v234_v59  ;;  %v1831_v39 = vunpack.i.h.bf16 %v2829_v14 }
  0xa8   :  { %v1926_v62 = vunpack.i.h.bf16 %v1924_v2  ;;  %v1925_v4 = vunpack.i.l.bf16 %v1924_v2  ;;  %2218 = vrot.lane.b32.xlu1 %v2655_v29, %s2499_s28  ;;  %v1845_v42 = vunpack.i.l.bf16 %v2847_v21  ;;  %v1846_v51 = vunpack.i.h.bf16 %v2847_v21 }
  0xa9   :  { %2213 = vrot.lane.b32.xlu0 %v2549_v7, %s2499_s28  ;;  %v1830_v7 = vunpack.i.l.bf16 %v2829_v14  ;;  %v2953_v37 = vsel %vm110_vm1, %v1850_v55, %v1810_v1  ;;  %v271_v58 = vpack.c.bf16 %v251_v22, %v250_v13  ;;  %v2959_v59 = vsel %vm110_vm1, %v1851_v26, %v1811_v63 }
  0xaa   :  { %298 = vmatpush1.bf16.msra.mxu1 %v269_v6  ;;  %v1939_v43 = vpop.permute.xlu1 %1938  ;;  %v236_v29 = vsel %vm227_vm0, %v1925_v4, %v1930_v61  ;;  %v237_v20 = vsel %vm227_vm0, %v1926_v62, %v1931_v56  ;;  %v252_v60 = vsel %vm227_vm0, %v1930_v61, %v1925_v4  ;;  %v253_v2 = vsel %vm227_vm0, %v1931_v56, %v1926_v62 }
  0xab   :  { %v1941_v38 = vunpack.i.h.bf16 %v1939_v43  ;;  %v1940_v48 = vunpack.i.l.bf16 %v1939_v43  ;;  %v1934_v52 = vpop.permute.xlu0 %1933  ;;  %299 = vmatprep.subr.bf16.mxu1 %v272_v36  ;;  %v274_v21 = vpack.c.bf16 %v237_v20, %v236_v29  ;;  %v2971_v6 = vsel %vm110_vm1, %v1845_v42, %v1805_v50 }
  0xac   :  { %v1936_v46 = vunpack.i.h.bf16 %v1934_v52  ;;  %v1935_v53 = vunpack.i.l.bf16 %v1934_v52  ;;  %2228 = vrot.lane.b32.xlu1 %v2651_v28, %s2498_s27  ;;  %v2979_v61 = vsel %vm110_vm1, %v1810_v1, %v1850_v55  ;;  %v2985_v56 = vsel %vm110_vm1, %v1846_v51, %v1806_v45 }
  0xad   :  { %2223 = vrot.lane.b32.xlu0 %v2571_v11, %s2498_s27  ;;  %v2992_v29 = vsel %vm110_vm1, %v1805_v50, %v1845_v42  ;;  %v273_v20 = vpack.c.bf16 %v253_v2, %v252_v60  ;;  %v3000_v52 = vsel %vm110_vm1, %v1806_v45, %v1846_v51 }
  0xae   :  { %300 = vmatpush1.bf16.msra.mxu1 %v271_v58  ;;  %v1949_v36 = vpop.permute.xlu1 %1948  ;;  %v238_v13 = vsel %vm227_vm0, %v1935_v53, %v1940_v48  ;;  %v239_v22 = vsel %vm227_vm0, %v1936_v46, %v1941_v38  ;;  %v254_v50 = vsel %vm227_vm0, %v1940_v48, %v1935_v53  ;;  %v255_v42 = vsel %vm227_vm0, %v1941_v38, %v1936_v46 }
  0xaf   :  { %v1951_v62 = vunpack.i.h.bf16 %v1949_v36  ;;  %v1950_v4 = vunpack.i.l.bf16 %v1949_v36  ;;  %v1944_v43 = vpop.permute.xlu0 %1943  ;;  %301 = vmatprep.subr.bf16.mxu1 %v274_v21  ;;  %v276_v58 = vpack.c.bf16 %v239_v22, %v238_v13  ;;  %v1860_v21 = vunpack.i.l.bf16 %v2853_v24 }
  0xb0   :  { %v1946_v1 = vunpack.i.h.bf16 %v1944_v43  ;;  %v1945_v55 = vunpack.i.l.bf16 %v1944_v43  ;;  %2238 = vrot.lane.b32.xlu1 %v2651_v28, %s2499_s28  ;;  %v3010_v28 = vsel %vm110_vm1, %v1811_v63, %v1851_v26  ;;  %v148_v63 = vpack.c.bf16 %v3000_v52, %v2992_v29 }
  0xb1   :  { %2233 = vrot.lane.b32.xlu0 %v2571_v11, %s2499_s28  ;;  %v147_v26 = vpack.c.bf16 %v2985_v56, %v2971_v6  ;;  %v1856_v24 = vunpack.i.h.bf16 %v2855_v25  ;;  %v275_v2 = vpack.c.bf16 %v255_v42, %v254_v50  ;;  %v1855_v36 = vunpack.i.l.bf16 %v2855_v25 }
  0xb2   :  { %302 = vmatpush1.bf16.msra.mxu1 %v273_v20  ;;  %v1959_v45 = vpop.permute.xlu1 %1958  ;;  %v240_v11 = vsel %vm227_vm0, %v1945_v55, %v1950_v4  ;;  %v241_v51 = vsel %vm227_vm0, %v1946_v1, %v1951_v62  ;;  %v256_v22 = vsel %vm227_vm0, %v1950_v4, %v1945_v55  ;;  %v257_v43 = vsel %vm227_vm0, %v1951_v62, %v1946_v1 }
  0xb3   :  { %v1961_v48 = vunpack.i.h.bf16 %v1959_v45  ;;  %v1960_v53 = vunpack.i.l.bf16 %v1959_v45  ;;  %v1954_v60 = vpop.permute.xlu0 %1953  ;;  %303 = vmatprep.subr.bf16.mxu1 %v276_v58  ;;  %v278_v13 = vpack.c.bf16 %v241_v51, %v240_v11  ;;  %v150_v25 = vpack.c.bf16 %v3010_v28, %v2979_v61 }
  0xb4   :  { %v1956_v38 = vunpack.i.h.bf16 %v1954_v60  ;;  %v1955_v46 = vunpack.i.l.bf16 %v1954_v60  ;;  %2248 = vrot.lane.b32.xlu1 %v2675_v35, %s2498_s27  ;;  %v3044_v4 = vsel %vm110_vm1, %v1861_v9, %v1821_v54  ;;  %v3050_v62 = vsel %vm110_vm1, %v1860_v21, %v1820_v57 }
  0xb5   :  { %2243 = vrot.lane.b32.xlu0 %v2533_v3, %s2498_s27  ;;  %v277_v60 = vpack.c.bf16 %v257_v43, %v256_v22 }
  0xb6   :  { %304 = vmatpush1.bf16.msra.mxu1 %v275_v2  ;;  %v1969_v20 = vpop.permute.xlu1 %1968  ;;  %v242_v58 = vsel %vm227_vm0, %v1955_v46, %v1960_v53  ;;  %v243_v50 = vsel %vm227_vm0, %v1956_v38, %v1961_v48  ;;  %v3058_v2 = vsel %vm110_vm1, %v1820_v57, %v1860_v21 }
  0xb7   :  { %v1971_v1 = vunpack.i.h.bf16 %v1969_v20  ;;  %v1970_v55 = vunpack.i.l.bf16 %v1969_v20  ;;  %v1964_v45 = vpop.permute.xlu0 %1963  ;;  %305 = vmatprep.subr.bf16.mxu1 %v278_v13  ;;  %v280_v42 = vpack.c.bf16 %v243_v50, %v242_v58  ;;  %v258_v20 = vsel %vm227_vm0, %v1960_v53, %v1955_v46 }
  0xb8   :  { %v1966_v11 = vunpack.i.h.bf16 %v1964_v45  ;;  %v1965_v51 = vunpack.i.l.bf16 %v1964_v45  ;;  %2258 = vrot.lane.b32.xlu1 %v2675_v35, %s2499_s28  ;;  %v259_v13 = vsel %vm227_vm0, %v1961_v48, %v1956_v38  ;;  %v3070_v35 = vsel %vm110_vm1, %v1821_v54, %v1861_v9 }
  0xb9   :  { %2253 = vrot.lane.b32.xlu0 %v2533_v3, %s2499_s28  ;;  %v3084_v9 = vsel %vm110_vm1, %v1856_v24, %v1816_v0  ;;  %v279_v50 = vpack.c.bf16 %v259_v13, %v258_v20  ;;  %v3104_v45 = vsel %vm110_vm1, %v1815_v44, %v1855_v36  ;;  %v154_v56 = vpack.c.bf16 %v3070_v35, %v3058_v2  ;;  %v2444_v2 = vld [vmem:[%s3848_s1 + $0x18] sm:$0xff]  }
  0xba   :  { %v953_v57 = vsel %vm951_vm2, %v1966_v11, %v1971_v1  ;;  %v952_v21 = vsel %vm951_vm2, %v1965_v51, %v1970_v55  ;;  %306 = vmatpush1.bf16.msra.mxu1 %v277_v60  ;;  %v1979_v3 = vpop.permute.xlu1 %1978  ;;  %v968_v53 = vsel %vm951_vm2, %v1970_v55, %v1965_v51  ;;  %v969_v48 = vsel %vm951_vm2, %v1971_v1, %v1966_v11  ;;  %v2443_v55 = vld [vmem:[%s3848_s1 + $0x10] sm:$0xff]  }
  0xbb   :  { %v989_v38 = vpack.c.bf16 %v953_v57, %v952_v21  ;;  %v1981_v12 = vunpack.i.h.bf16 %v1979_v3  ;;  %v1980_v46 = vunpack.i.l.bf16 %v1979_v3  ;;  %v1974_v22 = vpop.permute.xlu0 %1973  ;;  %307 = vmatprep.subr.bf16.mxu1 %v280_v42  ;;  %v990_v54 = vpack.c.bf16 %v969_v48, %v968_v53 }
  0xbc   :  { %v1976_v43 = vunpack.i.h.bf16 %v1974_v22  ;;  %v1975_v58 = vunpack.i.l.bf16 %v1974_v22  ;;  %2268 = vrot.lane.b32.xlu1 %v2671_v34, %s2498_s27  ;;  %v1826_v1 = vunpack.i.h.bf16 %v2831_v15  ;;  %v3093_v42 = vsel %vm110_vm1, %v1855_v36, %v1815_v44 }
  0xbd   :  { %2263 = vrot.lane.b32.xlu0 %v2565_v10, %s2498_s27  ;;  %1017 = vmatprep.subr.bf16.mxu0 %v990_v54  ;;  %v3110_v11 = vsel %vm110_vm1, %v1816_v0, %v1856_v24  ;;  %v1825_v51 = vunpack.i.l.bf16 %v2831_v15  ;;  %v1871_v24 = vunpack.i.h.bf16 %v2861_v27  ;;  %v151_v52 = vpack.c.bf16 %v3084_v9, %v3093_v42 }
  0xbe   :  { %v955_v60 = vsel %vm951_vm2, %v1976_v43, %v1981_v12  ;;  %v954_v20 = vsel %vm951_vm2, %v1975_v58, %v1980_v46  ;;  %308 = vmatpush1.bf16.msra.mxu1 %v279_v50  ;;  %1018 = vmatpush1.bf16.msra.mxu0 %v989_v38  ;;  %v1989_v13 = vpop.permute.xlu1 %1988  ;;  %v970_v44 = vsel %vm951_vm2, %v1980_v46, %v1975_v58  ;;  %v1870_v38 = vunpack.i.l.bf16 %v2861_v27 }
  0xbf   :  { %v991_v36 = vpack.c.bf16 %v955_v60, %v954_v20  ;;  %v1991_v8 = vunpack.i.h.bf16 %v1989_v13  ;;  %v1990_v57 = vunpack.i.l.bf16 %v1989_v13  ;;  %v1984_v21 = vpop.permute.xlu0 %1983  ;;  %358 = vmatprep.subr.bf16.mxu1 %v148_v63  ;;  %v971_v0 = vsel %vm951_vm2, %v1981_v12, %v1976_v43 }
  0xc0   :  { %v1986_v3 = vunpack.i.h.bf16 %v1984_v21  ;;  %v1985_v53 = vunpack.i.l.bf16 %v1984_v21  ;;  %2278 = vrot.lane.b32.xlu1 %v2671_v34, %s2499_s28  ;;  %v992_v48 = vpack.c.bf16 %v971_v0, %v970_v44  ;;  %v1866_v46 = vunpack.i.h.bf16 %v2863_v30 }
  0xc1   :  { %2273 = vrot.lane.b32.xlu0 %v2565_v10, %s2499_s28  ;;  %326 = vmatmul.mubr.bf16.vlgmr.msra.gmra.mrb[0].mxu1 %v2443_v55  ;;  %v152_v29 = vpack.c.bf16 %v3110_v11, %v3104_v45  ;;  %v1865_v63 = vunpack.i.l.bf16 %v2863_v30  ;;  %v3159_v61 = vsel %vm110_vm1, %v1871_v24, %v1831_v39  ;;  %v3165_v28 = vsel %vm110_vm1, %v1870_v38, %v1830_v7 }
  0xc2   :  { %v957_v34 = vsel %vm951_vm2, %v1986_v3, %v1991_v8  ;;  %v956_v27 = vsel %vm951_vm2, %v1985_v53, %v1990_v57  ;;  %1019 = vmatprep.subr.bf16.mxu0 %v992_v48  ;;  %359 = vmatpush1.bf16.msra.mxu1 %v147_v26  ;;  %v1999_v10 = vpop.permute.xlu1 %1998  ;;  %v972_v12 = vsel %vm951_vm2, %v1990_v57, %v1985_v53  ;;  %v1841_v35 = vunpack.i.h.bf16 %v2837_v18 }
  0xc3   :  { %v993_v22 = vpack.c.bf16 %v957_v34, %v956_v27  ;;  %1020 = vmatpush1.bf16.msra.mxu0 %v991_v36  ;;  %v2001_v54 = vunpack.i.h.bf16 %v1999_v10  ;;  %v2000_v9 = vunpack.i.l.bf16 %v1999_v10  ;;  %v1994_v43 = vpop.permute.xlu0 %1993  ;;  %360 = vmatprep.subr.bf16.mxu1 %v150_v25  ;;  %v973_v58 = vsel %vm951_vm2, %v1991_v8, %v1986_v3 }
  0xc4   :  { %v1996_v50 = vunpack.i.h.bf16 %v1994_v43  ;;  %v1995_v42 = vunpack.i.l.bf16 %v1994_v43  ;;  %2288 = vrot.lane.b32.xlu1 %v2695_v41, %s2498_s27  ;;  %v994_v6 = vpack.c.bf16 %v973_v58, %v972_v12  ;;  %335 = vmatprep.mubr.bf16.mxu1 %v2494_v5  ;;  %v153_v26 = vpack.c.bf16 %v3044_v4, %v3050_v62 }
  0xc5   :  { %2283 = vrot.lane.b32.xlu0 %v2603_v17, %s2498_s27  ;;  %v3175_v25 = vsel %vm110_vm1, %v1830_v7, %v1870_v38  ;;  %v3850_v4 = vpack.c.bf16 %v2959_v59, %v2953_v37  ;;  %v3198_v59 = vsel %vm110_vm1, %v1831_v39, %v1871_v24  ;;  %v1836_v57 = vunpack.i.h.bf16 %v2839_v19 }
  0xc6   :  { %v959_v55 = vsel %vm951_vm2, %v1996_v50, %v2001_v54  ;;  %v958_v45 = vsel %vm951_vm2, %v1995_v42, %v2000_v9  ;;  %1021 = vmatprep.subr.bf16.mxu0 %v994_v6  ;;  %v2009_v62 = vpop.permute.xlu1 %2008  ;;  %v974_v7 = vsel %vm951_vm2, %v2000_v9, %v1995_v42  ;;  %v975_v44 = vsel %vm951_vm2, %v2001_v54, %v1996_v50 }
  0xc7   :  { %361 = vmatpush1.bf16.msra.mxu1 %v3850_v4  ;;  %v995_v11 = vpack.c.bf16 %v959_v55, %v958_v45  ;;  %1022 = vmatpush1.bf16.msra.mxu0 %v993_v22  ;;  %v2011_v60 = vunpack.i.h.bf16 %v2009_v62  ;;  %v2010_v20 = vunpack.i.l.bf16 %v2009_v62  ;;  %v2004_v13 = vpop.permute.xlu0 %2003  ;;  %v996_v37 = vpack.c.bf16 %v975_v44, %v974_v7 }
  0xc8   :  { %362 = vmatprep.subr.bf16.mxu1 %v152_v29  ;;  %v2006_v36 = vunpack.i.h.bf16 %v2004_v13  ;;  %v2005_v8 = vunpack.i.l.bf16 %v2004_v13  ;;  %2298 = vrot.lane.b32.xlu1 %v2695_v41, %s2499_s28  ;;  %v135_v21 = vsel %vm110_vm1, %v1865_v63, %v1825_v51  ;;  %v119_v41 = vsel %vm110_vm1, %v1825_v51, %v1865_v63 }
  0xc9   :  { %2293 = vrot.lane.b32.xlu0 %v2603_v17, %s2499_s28  ;;  %v120_v14 = vsel %vm110_vm1, %v1826_v1, %v1866_v46  ;;  %336 = vmatmul.mubr.bf16.gmra.mrb[4].mxu1 %v2444_v2  ;;  %v1835_v39 = vunpack.i.l.bf16 %v2839_v19  ;;  %v1881_v10 = vunpack.i.h.bf16 %v2871_v32  ;;  %v1876_v12 = vunpack.i.h.bf16 %v2873_v33 }
  0xca   :  { %v961_v0 = vsel %vm951_vm2, %v2006_v36, %v2011_v60  ;;  %v960_v17 = vsel %vm951_vm2, %v2005_v8, %v2010_v20  ;;  %1023 = vmatprep.subr.bf16.mxu0 %v996_v37  ;;  %v2019_v24 = vpop.permute.xlu1 %2018  ;;  %v976_v51 = vsel %vm951_vm2, %v2010_v20, %v2005_v8  ;;  %v977_v29 = vsel %vm951_vm2, %v2011_v60, %v2006_v36 }
  0xcb   :  { %363 = vmatpush1.bf16.msra.mxu1 %v151_v52  ;;  %v997_v3 = vpack.c.bf16 %v961_v0, %v960_v17  ;;  %1024 = vmatpush1.bf16.msra.mxu0 %v995_v11  ;;  %v2021_v53 = vunpack.i.h.bf16 %v2019_v24  ;;  %v2020_v48 = vunpack.i.l.bf16 %v2019_v24  ;;  %v2014_v38 = vpop.permute.xlu0 %2013  ;;  %v136_v52 = vsel %vm110_vm1, %v1866_v46, %v1826_v1 }
  0xcc   :  { %364 = vmatprep.subr.bf16.mxu1 %v154_v56  ;;  %v2016_v63 = vunpack.i.h.bf16 %v2014_v38  ;;  %v2015_v34 = vunpack.i.l.bf16 %v2014_v38  ;;  %2308 = vrot.lane.b32.xlu1 %v2691_v40, %s2498_s27  ;;  %v998_v27 = vpack.c.bf16 %v977_v29, %v976_v51  ;;  %v1875_v22 = vunpack.i.l.bf16 %v2873_v33 }
  0xcd   :  { %390 = vmatprep.mubr.bf16.mxu1 %v2494_v5  ;;  %2303 = vrot.lane.b32.xlu0 %v2597_v16, %s2498_s27  ;;  %v156_v15 = vpack.c.bf16 %v120_v14, %v119_v41  ;;  %v1880_v30 = vunpack.i.l.bf16 %v2871_v32  ;;  %v158_v55 = vpack.c.bf16 %v3198_v59, %v3175_v25  ;;  %v157_v45 = vpack.c.bf16 %v3159_v61, %v3165_v28 }
  0xce   :  { %v963_v1 = vsel %vm951_vm2, %v2016_v63, %v2021_v53  ;;  %v962_v46 = vsel %vm951_vm2, %v2015_v34, %v2020_v48  ;;  %1025 = vmatprep.subr.bf16.mxu0 %v998_v27  ;;  %v2029_v54 = vpop.permute.xlu1 %2028  ;;  %v978_v9 = vsel %vm951_vm2, %v2020_v48, %v2015_v34  ;;  %v979_v42 = vsel %vm951_vm2, %v2021_v53, %v2016_v63 }
  0xcf   :  { %365 = vmatpush1.bf16.msra.mxu1 %v153_v26  ;;  %v999_v43 = vpack.c.bf16 %v963_v1, %v962_v46  ;;  %1026 = vmatpush1.bf16.msra.mxu0 %v997_v3  ;;  %v2031_v33 = vunpack.i.h.bf16 %v2029_v54  ;;  %v2030_v58 = vunpack.i.l.bf16 %v2029_v54  ;;  %v2024_v50 = vpop.permute.xlu0 %2023  ;;  %v1000_v2 = vpack.c.bf16 %v979_v42, %v978_v9  ;;  %v2462_v9 = vld [vmem:[%s3847_s0 + $0xe8] sm:$0xff] }
  0xd0   :  { %366 = vmatprep.subr.bf16.mxu1 %v156_v15  ;;  %v2026_v6 = vunpack.i.h.bf16 %v2024_v50  ;;  %v2025_v56 = vunpack.i.l.bf16 %v2024_v50  ;;  %2318 = vrot.lane.b32.xlu1 %v2691_v40, %s2499_s28  ;;  %v155_v26 = vpack.c.bf16 %v136_v52, %v135_v21  ;;  %v123_v4 = vsel %vm110_vm1, %v1835_v39, %v1875_v22 }
  0xd1   :  { %2313 = vrot.lane.b32.xlu0 %v2597_v16, %s2499_s28  ;;  %v124_v40 = vsel %vm110_vm1, %v1836_v57, %v1876_v12  ;;  %v1840_v62 = vunpack.i.l.bf16 %v2837_v18  ;;  %1027 = vmatprep.subr.bf16.mxu0 %v1000_v2  ;;  %v139_v59 = vsel %vm110_vm1, %v1875_v22, %v1835_v39  ;;  %v140_v21 = vsel %vm110_vm1, %v1876_v12, %v1836_v57  ;;  %v2461_v18 = vld [vmem:[%s3847_s0 + $0xf0] sm:$0xff] }
  0xd2   :  { %v965_v16 = vsel %vm951_vm2, %v2026_v6, %v2031_v33  ;;  %v964_v25 = vsel %vm951_vm2, %v2025_v56, %v2030_v58  ;;  %v2039_v61 = vpop.permute.xlu1 %2038  ;;  %v980_v28 = vsel %vm951_vm2, %v2030_v58, %v2025_v56  ;;  %v981_v13 = vsel %vm951_vm2, %v2031_v33, %v2026_v6 }
  0xd3   :  { %367 = vmatpush1.bf16.msra.mxu1 %v155_v26  ;;  %v1001_v7 = vpack.c.bf16 %v965_v16, %v964_v25  ;;  %1028 = vmatpush1.bf16.msra.mxu0 %v999_v43  ;;  %v2041_v11 = vunpack.i.h.bf16 %v2039_v61  ;;  %v2040_v60 = vunpack.i.l.bf16 %v2039_v61  ;;  %v2034_v20 = vpop.permute.xlu0 %2033  ;;  %v1002_v8 = vpack.c.bf16 %v981_v13, %v980_v28  ;;  %v2463_v43 = vld [vmem:[%s3847_s0 + $0xf8] sm:$0xff]  ;;  %v2464_v28 = vld [vmem:[%s3847_s0 + $0x8] sm:$0xff]  ;;  %v2467_v13 = vld [vmem:[%s3847_s0 + $0x10] sm:$0xff] }
  0xd4   :  { %368 = vmatprep.subr.bf16.mxu1 %v158_v55  ;;  %v2036_v44 = vunpack.i.h.bf16 %v2034_v20  ;;  %v2035_v36 = vunpack.i.l.bf16 %v2034_v20  ;;  %2328 = vrot.lane.b32.xlu1 %v2716_v49, %s2498_s27  ;;  %v125_v37 = vsel %vm110_vm1, %v1840_v62, %v1880_v30  ;;  %v160_v41 = vpack.c.bf16 %v124_v40, %v123_v4  ;;  %v2446_v55 = vld [vmem:[%s3848_s1] sm:$0xff]  }
  0xd5   :  { %2323 = vrot.lane.b32.xlu0 %v2635_v23, %s2498_s27  ;;  %v126_v14 = vsel %vm110_vm1, %v1841_v35, %v1881_v10  ;;  %1029 = vmatprep.subr.bf16.mxu0 %v1002_v8  ;;  %v159_v52 = vpack.c.bf16 %v140_v21, %v139_v59  ;;  %v142_v63 = vsel %vm110_vm1, %v1881_v10, %v1841_v35  ;;  %v2466_v20 = vld [vmem:[%s3847_s0] sm:$0xff] }
  0xd6   :  { %v967_v0 = vsel %vm951_vm2, %v2036_v44, %v2041_v11  ;;  %v966_v19 = vsel %vm951_vm2, %v2035_v36, %v2040_v60  ;;  %v2049_v57 = vpop.permute.xlu1 %2048  ;;  %v982_v39 = vsel %vm951_vm2, %v2040_v60, %v2035_v36  ;;  %v983_v53 = vsel %vm951_vm2, %v2041_v11, %v2036_v44 }
  0xd7   :  { %369 = vmatpush1.bf16.msra.mxu1 %v157_v45  ;;  %v1003_v17 = vpack.c.bf16 %v967_v0, %v966_v19  ;;  %1030 = vmatpush1.bf16.msra.mxu0 %v1001_v7  ;;  %v2051_v24 = vunpack.i.h.bf16 %v2049_v57  ;;  %v2050_v51 = vunpack.i.l.bf16 %v2049_v57  ;;  %v2044_v3 = vpop.permute.xlu0 %2043  ;;  %v1004_v29 = vpack.c.bf16 %v983_v53, %v982_v39  ;;  %v2465_v7 = vld [vmem:[%s3847_s0 + $0x18] sm:$0xff] }
  0xd8   :  { %370 = vmatprep.subr.bf16.mxu1 %v160_v41  ;;  %v2046_v48 = vunpack.i.h.bf16 %v2044_v3  ;;  %v2045_v38 = vunpack.i.l.bf16 %v2044_v3  ;;  %2338 = vrot.lane.b32.xlu1 %v2716_v49, %s2499_s28  ;;  %v141_v34 = vsel %vm110_vm1, %v1880_v30, %v1840_v62  ;;  %v162_v27 = vpack.c.bf16 %v126_v14, %v125_v37  ;;  %v2460_v49 = vld [vmem:[%s3847_s0 + $0xe0] sm:$0xff]  ;;  %v2447_v30 = vld [vmem:[%s3848_s1 + $0x50] sm:$0xff]   ;;  %v2449_v57 = vld [vmem:[%s3848_s1 + $0x58] sm:$0xff]  }
  0xd9   :  { %2333 = vrot.lane.b32.xlu0 %v2635_v23, %s2499_s28  ;;  %v3325_v12 = vpack.i.bf16 %v2461_v18, %v2460_v49  ;;  %1031 = vmatprep.subr.bf16.mxu0 %v1004_v29  ;;  %v161_v54 = vpack.c.bf16 %v142_v63, %v141_v34  ;;  %v3343_v33 = vpack.i.bf16 %v2463_v43, %v2462_v9  ;;  %v2469_v3 = vld [vmem:[%s3847_s0 + $0x38] sm:$0xff]  ;;  %v2474_v9 = vld [vmem:[%s3847_s0 + $0x40] sm:$0xff]  ;;  %v2475_v43 = vld [vmem:[%s3847_s0 + $0x50] sm:$0xff] }
  0xda   :  { %v2059_v32 = vpop.permute.xlu1 %2058  ;;  %v476_v35 = vsel %vm475_vm3, %v2045_v38, %v2050_v51  ;;  %v477_v15 = vsel %vm475_vm3, %v2046_v48, %v2051_v24  ;;  %v493_v58 = vsel %vm475_vm3, %v2051_v24, %v2046_v48  ;;  %v492_v50 = vsel %vm475_vm3, %v2050_v51, %v2045_v38  ;;  %v2468_v51 = vld [vmem:[%s3847_s0 + $0x28] sm:$0xff]  ;;  %v2470_v48 = vld [vmem:[%s3847_s0 + $0x20] sm:$0xff]  ;;  %v2471_v38 = vld [vmem:[%s3847_s0 + $0x30] sm:$0xff] }
  0xdb   :  { %371 = vmatpush1.bf16.msra.mxu1 %v159_v52  ;;  %1032 = vmatpush1.bf16.msra.mxu0 %v1003_v17  ;;  %v2061_v10 = vunpack.i.h.bf16 %v2059_v32  ;;  %v2060_v23 = vunpack.i.l.bf16 %v2059_v32  ;;  %v2054_v22 = vpop.permute.xlu0 %2053  ;;  %v2367_v11 = vpack.i.bf16 %v2465_v7, %v2464_v28  ;;  %v513_v60 = vpack.c.bf16 %v493_v58, %v492_v50  ;;  %v2478_v28 = vld [vmem:[%s3847_s0 + $0x60] sm:$0xff]  ;;  %v2479_v7 = vld [vmem:[%s3847_s0 + $0x70] sm:$0xff] }
  0xdc   :  { %372 = vmatprep.subr.bf16.mxu1 %v162_v27  ;;  %v2056_v1 = vunpack.i.h.bf16 %v2054_v22  ;;  %v2055_v46 = vunpack.i.l.bf16 %v2054_v22  ;;  %2348 = vrot.lane.b32.xlu1 %v2711_v47, %s2498_s27  ;;  %v514_v47 = vpack.c.bf16 %v477_v15, %v476_v35  ;;  %v2362_v44 = vpack.i.bf16 %v2467_v13, %v2466_v20  ;;  %v2448_v22 = vld [vmem:[%s3848_s1 + $0x8] sm:$0xff]  }
  0xdd   :  { %2343 = vrot.lane.b32.xlu0 %v3325_v12, %s2498_s27  ;;  %s2500_s27 = smov 111   ;;  %v2377_v53 = vpack.i.bf16 %v2469_v3, %v2468_v51  ;;  %v2372_v29 = vpack.i.bf16 %v2471_v38, %v2470_v48  ;;  %v2382_v58 = vpack.i.bf16 %v2475_v43, %v2474_v9 }
  0xde   :  { %v1144_v42 = vsel %vm1142_vm4, %v2056_v1, %v2061_v10  ;;  %v1143_v6 = vsel %vm1142_vm4, %v2055_v46, %v2060_v23  ;;  %v2069_v56 = vpop.permute.xlu1 %2068  ;;  %v1159_v2 = vsel %vm1142_vm4, %v2060_v23, %v2055_v46  ;;  %v1160_v26 = vsel %vm1142_vm4, %v2061_v10, %v2056_v1  ;;  %1050 = vmatmul.mubr.bf16.vlgmr.msra.gmra.mrb[0].mxu0 %v2447_v30  ;;  %v2472_v1 = vld [vmem:[%s3847_s0 + $0x48] sm:$0xff]  ;;  %v2473_v46 = vld [vmem:[%s3847_s0 + $0x58] sm:$0xff] }
  0xdf   :  { %373 = vmatpush1.bf16.msra.mxu1 %v161_v54  ;;  %v1180_v45 = vpack.c.bf16 %v1144_v42, %v1143_v6  ;;  %v2071_v4 = vunpack.i.h.bf16 %v2069_v56  ;;  %v2070_v40 = vunpack.i.l.bf16 %v2069_v56  ;;  %v2064_v62 = vpop.permute.xlu0 %2063  ;;  %v1181_v16 = vpack.c.bf16 %v1160_v26, %v1159_v2  ;;  %1059 = vmatprep.mubr.bf16.mxu0 %v2494_v5 }
  0xe0   :  { %541 = vmatprep.subr.bf16.mxu1 %v514_v47  ;;  %v2066_v25 = vunpack.i.h.bf16 %v2064_v62  ;;  %v2065_v61 = vunpack.i.l.bf16 %v2064_v62  ;;  %2358 = vrot.lane.b32.xlu1 %v3343_v33, %s2499_s28  ;;  %v2387_v54 = vpack.i.bf16 %v2473_v46, %v2472_v1 }
  0xe1   :  { %2353 = vrot.lane.b32.xlu0 %v3325_v12, %s2499_s28  ;;  %1208 = vmatprep.subr.bf16.mxu0 %v1181_v16  ;;  %v2476_v16 = vld [vmem:[%s3847_s0 + $0x68] sm:$0xff] }
  0xe2   :  { %v495_v36 = vsel %vm475_vm3, %v2071_v4, %v2066_v25  ;;  %v494_v8 = vsel %vm475_vm3, %v2070_v40, %v2065_v61  ;;  %391 = vmatmul.mubr.bf16.vlgmr.msra.gmra.mrb[0].mxu1 %v2446_v55  ;;  %1209 = vmatpush1.bf16.msra.mxu0 %v1180_v45  ;;  %v2079_v37 = vpop.permute.xlu1 %2078  ;;  %v478_v59 = vsel %vm475_vm3, %v2065_v61, %v2070_v40 }
  0xe3   :  { %v515_v21 = vpack.c.bf16 %v495_v36, %v494_v8  ;;  %542 = vmatpush1.bf16.msra.mxu1 %v513_v60  ;;  %v2081_v41 = vunpack.i.h.bf16 %v2079_v37  ;;  %v2080_v14 = vunpack.i.l.bf16 %v2079_v37  ;;  %v2074_v0 = vpop.permute.xlu0 %2073  ;;  %v479_v19 = vsel %vm475_vm3, %v2066_v25, %v2071_v4  ;;  %400 = vmatprep.mubr.bf16.mxu1 %v2494_v5  ;;  %v2477_v25 = vld [vmem:[%s3847_s0 + $0x78] sm:$0xff] }
  0xe4   :  { %v2076_v39 = vunpack.i.h.bf16 %v2074_v0  ;;  %v2075_v17 = vunpack.i.l.bf16 %v2074_v0  ;;  %2368 = vrot.lane.b32.xlu1 %v2367_v11, %s2500_s27  ;;  %v516_v24 = vpack.c.bf16 %v479_v19, %v478_v59  ;;  %v2397_v61 = vpack.i.bf16 %v2477_v25, %v2476_v16  ;;  %v2480_v19 = vld [vmem:[%s3847_s0 + $0x88] sm:$0xff] }
  0xe5   :  { %2363 = vrot.lane.b32.xlu0 %v2362_v44, %s2500_s27  ;;  %v2392_v11 = vpack.i.bf16 %v2479_v7, %v2478_v28 }
  0xe6   :  { %v1146_v52 = vsel %vm1142_vm4, %v2076_v39, %v2081_v41  ;;  %v1145_v63 = vsel %vm1142_vm4, %v2075_v17, %v2080_v14  ;;  %543 = vmatprep.subr.bf16.mxu1 %v516_v24  ;;  %v2089_v34 = vpop.permute.xlu1 %2088  ;;  %v1161_v27 = vsel %vm1142_vm4, %v2080_v14, %v2075_v17  ;;  %v1162_v49 = vsel %vm1142_vm4, %v2081_v41, %v2076_v39  ;;  %v2482_v17 = vld [vmem:[%s3847_s0 + $0x80] sm:$0xff]  ;;  %v2483_v24 = vld [vmem:[%s3847_s0 + $0x90] sm:$0xff] }
  0xe7   :  { %v1182_v18 = vpack.c.bf16 %v1146_v52, %v1145_v63  ;;  %544 = vmatpush1.bf16.msra.mxu1 %v515_v21  ;;  %v2091_v32 = vunpack.i.h.bf16 %v2089_v34  ;;  %v2090_v35 = vunpack.i.l.bf16 %v2089_v34  ;;  %v2084_v10 = vpop.permute.xlu0 %2083  ;;  %v1183_v23 = vpack.c.bf16 %v1162_v49, %v1161_v27  ;;  %1060 = vmatmul.mubr.bf16.gmra.mrb[4].mxu0 %v2449_v57  ;;  %v2481_v57 = vld [vmem:[%s3847_s0 + $0x98] sm:$0xff] }
  0xe8   :  { %v2086_v15 = vunpack.i.h.bf16 %v2084_v10  ;;  %v2085_v30 = vunpack.i.l.bf16 %v2084_v10  ;;  %2378 = vrot.lane.b32.xlu1 %v2377_v53, %s2500_s27  ;;  %1240 = vmatprep.mubr.bf16.mxu0 %v2494_v5  ;;  %v2407_v39 = vpack.i.bf16 %v2481_v57, %v2480_v19  ;;  %v2402_v51 = vpack.i.bf16 %v2483_v24, %v2482_v17  ;;  %v2485_v10 = vld [vmem:[%s3847_s0 + $0xb8] sm:$0xff] }
  0xe9   :  { %2373 = vrot.lane.b32.xlu0 %v2372_v29, %s2500_s27  ;;  %1210 = vmatprep.subr.bf16.mxu0 %v1183_v23 }
  0xea   :  { %v497_v50 = vsel %vm475_vm3, %v2091_v32, %v2086_v15  ;;  %v496_v47 = vsel %vm475_vm3, %v2090_v35, %v2085_v30  ;;  %1211 = vmatpush1.bf16.msra.mxu0 %v1182_v18  ;;  %v2099_v42 = vpop.permute.xlu1 %2098  ;;  %v480_v6 = vsel %vm475_vm3, %v2085_v30, %v2090_v35  ;;  %v481_v56 = vsel %vm475_vm3, %v2086_v15, %v2091_v32  ;;  %v2484_v35 = vld [vmem:[%s3847_s0 + $0xa8] sm:$0xff]  ;;  %v2487_v15 = vld [vmem:[%s3847_s0 + $0xb0] sm:$0xff] }
  0xeb   :  { %v517_v2 = vpack.c.bf16 %v497_v50, %v496_v47  ;;  %v2101_v26 = vunpack.i.h.bf16 %v2099_v42  ;;  %v2100_v55 = vunpack.i.l.bf16 %v2099_v42  ;;  %v2094_v45 = vpop.permute.xlu0 %2093  ;;  %v518_v4 = vpack.c.bf16 %v481_v56, %v480_v6  ;;  %401 = vmatmul.mubr.bf16.gmra.mrb[4].mxu1 %v2448_v22  ;;  %v2486_v22 = vld [vmem:[%s3847_s0 + $0xa0] sm:$0xff] }
  0xec   :  { %v2096_v40 = vunpack.i.h.bf16 %v2094_v45  ;;  %v2095_v62 = vunpack.i.l.bf16 %v2094_v45  ;;  %2388 = vrot.lane.b32.xlu1 %v2387_v54, %s2500_s27  ;;  %573 = vmatprep.mubr.bf16.mxu1 %v2494_v5  ;;  %v2417_v23 = vpack.i.bf16 %v2485_v10, %v2484_v35  ;;  %v2412_v30 = vpack.i.bf16 %v2487_v15, %v2486_v22 }
  0xed   :  { %2383 = vrot.lane.b32.xlu0 %v2382_v58, %s2500_s27  ;;  %545 = vmatprep.subr.bf16.mxu1 %v518_v4  ;;  %v2490_v4 = vld [vmem:[%s3847_s0 + $0xc0] sm:$0xff] }
  0xee   :  { %v1148_v60 = vsel %vm1142_vm4, %v2096_v40, %v2101_v26  ;;  %v1147_v20 = vsel %vm1142_vm4, %v2095_v62, %v2100_v55  ;;  %546 = vmatpush1.bf16.msra.mxu1 %v517_v2  ;;  %v2109_v13 = vpop.permute.xlu1 %2108  ;;  %v1163_v44 = vsel %vm1142_vm4, %v2100_v55, %v2095_v62  ;;  %v1164_v36 = vsel %vm1142_vm4, %v2101_v26, %v2096_v40  ;;  %v2488_v26 = vld [vmem:[%s3847_s0 + $0xc8] sm:$0xff]  ;;  %v2489_v55 = vld [vmem:[%s3847_s0 + $0xd8] sm:$0xff]  ;;  %v2491_v40 = vld [vmem:[%s3847_s0 + $0xd0] sm:$0xff] }
  0xef   :  { %v1184_v8 = vpack.c.bf16 %v1148_v60, %v1147_v20  ;;  %v2111_v37 = vunpack.i.h.bf16 %v2109_v13  ;;  %v2110_v59 = vunpack.i.l.bf16 %v2109_v13  ;;  %v2104_v21 = vpop.permute.xlu0 %2103  ;;  %v1185_v41 = vpack.c.bf16 %v1164_v36, %v1163_v44 }
  0xf0   :  { %v2106_v14 = vunpack.i.h.bf16 %v2104_v21  ;;  %v2105_v0 = vunpack.i.l.bf16 %v2104_v21  ;;  %2398 = vrot.lane.b32.xlu1 %v2397_v61, %s2500_s27  ;;  %v2427_v45 = vpack.i.bf16 %v2489_v55, %v2488_v26  ;;  %v2422_v62 = vpack.i.bf16 %v2491_v40, %v2490_v4 }
  0xf1   :  { %2393 = vrot.lane.b32.xlu0 %v2392_v11, %s2500_s27  ;;  %1212 = vmatprep.subr.bf16.mxu0 %v1185_v41 }
  0xf2   :  { %v499_v3 = vsel %vm475_vm3, %v2111_v37, %v2106_v14  ;;  %v498_v53 = vsel %vm475_vm3, %v2110_v59, %v2105_v0  ;;  %1213 = vmatpush1.bf16.msra.mxu0 %v1184_v8  ;;  %v2119_v48 = vpop.permute.xlu1 %2118  ;;  %v482_v38 = vsel %vm475_vm3, %v2105_v0, %v2110_v59  ;;  %v483_v29 = vsel %vm475_vm3, %v2106_v14, %v2111_v37 }
  0xf3   :  { %v519_v52 = vpack.c.bf16 %v499_v3, %v498_v53  ;;  %v2121_v63 = vunpack.i.h.bf16 %v2119_v48  ;;  %v2120_v34 = vunpack.i.l.bf16 %v2119_v48  ;;  %v2114_v27 = vpop.permute.xlu0 %2113  ;;  %v520_v49 = vpack.c.bf16 %v483_v29, %v482_v38 }
  0xf4   :  { %v2116_v18 = vunpack.i.h.bf16 %v2114_v27  ;;  %v2115_v32 = vunpack.i.l.bf16 %v2114_v27  ;;  %2408 = vrot.lane.b32.xlu1 %v2407_v39, %s2500_s27 }
  0xf5   :  { %2403 = vrot.lane.b32.xlu0 %v2402_v51, %s2500_s27  ;;  %547 = vmatprep.subr.bf16.mxu1 %v520_v49 }
  0xf6   :  { %v1150_v1 = vsel %vm1142_vm4, %v2116_v18, %v2121_v63  ;;  %v1149_v46 = vsel %vm1142_vm4, %v2115_v32, %v2120_v34  ;;  %548 = vmatpush1.bf16.msra.mxu1 %v519_v52  ;;  %v2129_v54 = vpop.permute.xlu1 %2128  ;;  %v1165_v9 = vsel %vm1142_vm4, %v2120_v34, %v2115_v32  ;;  %v1166_v43 = vsel %vm1142_vm4, %v2121_v63, %v2116_v18 }
  0xf7   :  { %v1186_v58 = vpack.c.bf16 %v1150_v1, %v1149_v46  ;;  %v2131_v50 = vunpack.i.h.bf16 %v2129_v54  ;;  %v2130_v47 = vunpack.i.l.bf16 %v2129_v54  ;;  %v2124_v42 = vpop.permute.xlu0 %2123  ;;  %v1187_v6 = vpack.c.bf16 %v1166_v43, %v1165_v9 }
  0xf8   :  { %v2126_v56 = vunpack.i.h.bf16 %v2124_v42  ;;  %v2125_v2 = vunpack.i.l.bf16 %v2124_v42  ;;  %2418 = vrot.lane.b32.xlu1 %v2417_v23, %s2500_s27 }
  0xf9   :  { %2413 = vrot.lane.b32.xlu0 %v2412_v30, %s2500_s27  ;;  %1214 = vmatprep.subr.bf16.mxu0 %v1187_v6 }
  0xfa   :  { %v501_v16 = vsel %vm475_vm3, %v2131_v50, %v2126_v56  ;;  %v500_v25 = vsel %vm475_vm3, %v2130_v47, %v2125_v2  ;;  %1215 = vmatpush1.bf16.msra.mxu0 %v1186_v58  ;;  %v2139_v61 = vpop.permute.xlu1 %2138  ;;  %v484_v28 = vsel %vm475_vm3, %v2125_v2, %v2130_v47  ;;  %v485_v7 = vsel %vm475_vm3, %v2126_v56, %v2131_v50 }
  0xfb   :  { %v521_v11 = vpack.c.bf16 %v501_v16, %v500_v25  ;;  %v2141_v60 = vunpack.i.h.bf16 %v2139_v61  ;;  %v2140_v20 = vunpack.i.l.bf16 %v2139_v61  ;;  %v2134_v13 = vpop.permute.xlu0 %2133  ;;  %v522_v44 = vpack.c.bf16 %v485_v7, %v484_v28 }
  0xfc   :  { %v2136_v36 = vunpack.i.h.bf16 %v2134_v13  ;;  %v2135_v8 = vunpack.i.l.bf16 %v2134_v13  ;;  %2428 = vrot.lane.b32.xlu1 %v2427_v45, %s2500_s27 }
  0xfd   :  { %2423 = vrot.lane.b32.xlu0 %v2422_v62, %s2500_s27  ;;  %549 = vmatprep.subr.bf16.mxu1 %v522_v44 }
  0xfe   :  { %v1152_v37 = vsel %vm1142_vm4, %v2136_v36, %v2141_v60  ;;  %v1151_v59 = vsel %vm1142_vm4, %v2135_v8, %v2140_v20  ;;  %550 = vmatpush1.bf16.msra.mxu1 %v521_v11  ;;  %v2149_v21 = vpop.permute.xlu1 %2148  ;;  %v1167_v41 = vsel %vm1142_vm4, %v2140_v20, %v2135_v8  ;;  %v1168_v14 = vsel %vm1142_vm4, %v2141_v60, %v2136_v36 }
  0xff   :  { %v1188_v0 = vpack.c.bf16 %v1152_v37, %v1151_v59  ;;  %v2151_v19 = vunpack.i.h.bf16 %v2149_v21  ;;  %v2150_v57 = vunpack.i.l.bf16 %v2149_v21  ;;  %v2144_v39 = vpop.permute.xlu0 %2143  ;;  %v1189_v17 = vpack.c.bf16 %v1168_v14, %v1167_v41 }
 0x100   :  { %v2146_v24 = vunpack.i.h.bf16 %v2144_v39  ;;  %v2145_v51 = vunpack.i.l.bf16 %v2144_v39  ;;  %2438 = vrot.lane.b32.xlu1 %v3343_v33, %s2500_s27 }
 0x101   :  { %2433 = vrot.lane.b32.xlu0 %v3325_v12, %s2500_s27  ;;  %1216 = vmatprep.subr.bf16.mxu0 %v1189_v17 }
 0x102   :  { %v503_v3 = vsel %vm475_vm3, %v2151_v19, %v2146_v24  ;;  %v502_v53 = vsel %vm475_vm3, %v2150_v57, %v2145_v51  ;;  %1217 = vmatpush1.bf16.msra.mxu0 %v1188_v0  ;;  %v2159_v48 = vpop.permute.xlu1 %2158  ;;  %v486_v38 = vsel %vm475_vm3, %v2145_v51, %v2150_v57  ;;  %v487_v29 = vsel %vm475_vm3, %v2146_v24, %v2151_v19  ;;  %v2450_v24 = vld [vmem:[%s3848_s1 + $0x20] sm:$0xff]  }
 0x103   :  { %v523_v52 = vpack.c.bf16 %v503_v3, %v502_v53  ;;  %v2161_v33 = vunpack.i.h.bf16 %v2159_v48  ;;  %v2160_v63 = vunpack.i.l.bf16 %v2159_v48  ;;  %v2154_v34 = vpop.permute.xlu0 %2153  ;;  %v524_v12 = vpack.c.bf16 %v487_v29, %v486_v38 }
 0x104   :  { %v2156_v27 = vunpack.i.h.bf16 %v2154_v34  ;;  %v2155_v49 = vunpack.i.l.bf16 %v2154_v34 }
 0x105   :  { %551 = vmatprep.subr.bf16.mxu1 %v524_v12 }
 0x106   :  { %v1154_v18 = vsel %vm1142_vm4, %v2156_v27, %v2161_v33  ;;  %v1153_v32 = vsel %vm1142_vm4, %v2155_v49, %v2160_v63  ;;  %552 = vmatpush1.bf16.msra.mxu1 %v523_v52  ;;  %v2169_v35 = vpop.permute.xlu1 %2168  ;;  %v1169_v10 = vsel %vm1142_vm4, %v2160_v63, %v2155_v49  ;;  %v1170_v23 = vsel %vm1142_vm4, %v2161_v33, %v2156_v27  ;;  %v2451_v49 = vld [vmem:[%s3848_s1 + $0x60] sm:$0xff]  }
 0x107   :  { %v1190_v22 = vpack.c.bf16 %v1154_v18, %v1153_v32  ;;  %v2171_v15 = vunpack.i.h.bf16 %v2169_v35  ;;  %v2170_v30 = vunpack.i.l.bf16 %v2169_v35  ;;  %v2164_v1 = vpop.permute.xlu0 %2163  ;;  %v1191_v46 = vpack.c.bf16 %v1170_v23, %v1169_v10 }
 0x108   :  { %v2166_v54 = vunpack.i.h.bf16 %v2164_v1  ;;  %v2165_v9 = vunpack.i.l.bf16 %v2164_v1 }
 0x109   :  { %1218 = vmatprep.subr.bf16.mxu0 %v1191_v46 }
 0x10a   :  { %v505_v43 = vsel %vm475_vm3, %v2171_v15, %v2166_v54  ;;  %v504_v58 = vsel %vm475_vm3, %v2170_v30, %v2165_v9  ;;  %1219 = vmatpush1.bf16.msra.mxu0 %v1190_v22  ;;  %v2179_v50 = vpop.permute.xlu1 %2178  ;;  %v488_v47 = vsel %vm475_vm3, %v2165_v9, %v2170_v30  ;;  %v489_v42 = vsel %vm475_vm3, %v2166_v54, %v2171_v15 }
 0x10b   :  { %v525_v6 = vpack.c.bf16 %v505_v43, %v504_v58  ;;  %v2181_v56 = vunpack.i.h.bf16 %v2179_v50  ;;  %v2180_v2 = vunpack.i.l.bf16 %v2179_v50  ;;  %v2174_v26 = vpop.permute.xlu0 %2173  ;;  %v526_v55 = vpack.c.bf16 %v489_v42, %v488_v47  ;;  %v2452_v43 = vld [vmem:[%s3848_s1 + $0x28] sm:$0xff]  }
 0x10c   :  { %v2176_v45 = vunpack.i.h.bf16 %v2174_v26  ;;  %v2175_v4 = vunpack.i.l.bf16 %v2174_v26 }
 0x10d   :  { %553 = vmatprep.subr.bf16.mxu1 %v526_v55 }
 0x10e   :  { %v1156_v40 = vsel %vm1142_vm4, %v2176_v45, %v2181_v56  ;;  %v1155_v62 = vsel %vm1142_vm4, %v2175_v4, %v2180_v2  ;;  %554 = vmatpush1.bf16.msra.mxu1 %v525_v6  ;;  %v2189_v16 = vpop.permute.xlu1 %2188  ;;  %v1171_v25 = vsel %vm1142_vm4, %v2180_v2, %v2175_v4  ;;  %v1172_v61 = vsel %vm1142_vm4, %v2181_v56, %v2176_v45 }
 0x10f   :  { %v1192_v28 = vpack.c.bf16 %v1156_v40, %v1155_v62  ;;  %v2191_v7 = vunpack.i.h.bf16 %v2189_v16  ;;  %v2190_v11 = vunpack.i.l.bf16 %v2189_v16  ;;  %v2184_v60 = vpop.permute.xlu0 %2183  ;;  %v1193_v20 = vpack.c.bf16 %v1172_v61, %v1171_v25  ;;  %v2453_v62 = vld [vmem:[%s3848_s1 + $0x68] sm:$0xff]  }
 0x110   :  { %v2186_v13 = vunpack.i.h.bf16 %v2184_v60  ;;  %v2185_v44 = vunpack.i.l.bf16 %v2184_v60 }
 0x111   :  { %1220 = vmatprep.subr.bf16.mxu0 %v1193_v20 }
 0x112   :  { %v507_v36 = vsel %vm475_vm3, %v2191_v7, %v2186_v13  ;;  %v506_v8 = vsel %vm475_vm3, %v2190_v11, %v2185_v44  ;;  %1221 = vmatpush1.bf16.msra.mxu0 %v1192_v28  ;;  %v2199_v37 = vpop.permute.xlu1 %2198  ;;  %v490_v59 = vsel %vm475_vm3, %v2185_v44, %v2190_v11  ;;  %v491_v21 = vsel %vm475_vm3, %v2186_v13, %v2191_v7 }
 0x113   :  { %v527_v41 = vpack.c.bf16 %v507_v36, %v506_v8  ;;  %v2201_v14 = vunpack.i.h.bf16 %v2199_v37  ;;  %v2200_v0 = vunpack.i.l.bf16 %v2199_v37  ;;  %v2194_v19 = vpop.permute.xlu0 %2193  ;;  %v528_v57 = vpack.c.bf16 %v491_v21, %v490_v59 }
 0x114   :  { %v2196_v39 = vunpack.i.h.bf16 %v2194_v19  ;;  %v2195_v17 = vunpack.i.l.bf16 %v2194_v19 }
 0x115   :  { %555 = vmatprep.subr.bf16.mxu1 %v528_v57 }
 0x116   :  { %v1158_v51 = vsel %vm1142_vm4, %v2196_v39, %v2201_v14  ;;  %v1157_v3 = vsel %vm1142_vm4, %v2195_v17, %v2200_v0  ;;  %556 = vmatpush1.bf16.msra.mxu1 %v527_v41  ;;  %v2209_v53 = vpop.permute.xlu1 %2208  ;;  %v1173_v48 = vsel %vm1142_vm4, %v2200_v0, %v2195_v17  ;;  %v1174_v38 = vsel %vm1142_vm4, %v2201_v14, %v2196_v39 }
 0x117   :  { %v1194_v29 = vpack.c.bf16 %v1158_v51, %v1157_v3  ;;  %v2211_v52 = vunpack.i.h.bf16 %v2209_v53  ;;  %v2210_v33 = vunpack.i.l.bf16 %v2209_v53  ;;  %v2204_v63 = vpop.permute.xlu0 %2203  ;;  %v1195_v34 = vpack.c.bf16 %v1174_v38, %v1173_v48 }
 0x118   :  { %v2206_v12 = vunpack.i.h.bf16 %v2204_v63  ;;  %v2205_v27 = vunpack.i.l.bf16 %v2204_v63 }
 0x119   :  { %1222 = vmatprep.subr.bf16.mxu0 %v1195_v34  ;;  %574 = vmatmul.mubr.bf16.vlgmr.msra.gmra.mrb[0].mxu1 %v2450_v24 }
 0x11a   :  { %v684_v18 = vsel %vm666_vm5, %v2211_v52, %v2206_v12  ;;  %v683_v32 = vsel %vm666_vm5, %v2210_v33, %v2205_v27  ;;  %1223 = vmatpush1.bf16.msra.mxu0 %v1194_v29  ;;  %v2219_v35 = vpop.permute.xlu1 %2218  ;;  %v667_v10 = vsel %vm666_vm5, %v2205_v27, %v2210_v33  ;;  %v668_v23 = vsel %vm666_vm5, %v2206_v12, %v2211_v52 }
 0x11b   :  { %v704_v22 = vpack.c.bf16 %v684_v18, %v683_v32  ;;  %v2221_v15 = vunpack.i.h.bf16 %v2219_v35  ;;  %v2220_v30 = vunpack.i.l.bf16 %v2219_v35  ;;  %v2214_v1 = vpop.permute.xlu0 %2213  ;;  %v705_v46 = vpack.c.bf16 %v668_v23, %v667_v10  ;;  %583 = vmatprep.mubr.bf16.mxu1 %v2494_v5 }
 0x11c   :  { %v2216_v54 = vunpack.i.h.bf16 %v2214_v1  ;;  %v2215_v9 = vunpack.i.l.bf16 %v2214_v1 }
 0x11d   :  { %732 = vmatprep.subr.bf16.mxu1 %v705_v46  ;;  %1241 = vmatmul.mubr.bf16.vlgmr.msra.gmra.mrb[0].mxu0 %v2451_v49 }
 0x11e   :  { %v1335_v58 = vsel %vm1333_vm6, %v2216_v54, %v2221_v15  ;;  %v1334_v50 = vsel %vm1333_vm6, %v2215_v9, %v2220_v30  ;;  %733 = vmatpush1.bf16.msra.mxu1 %v704_v22  ;;  %v2229_v47 = vpop.permute.xlu1 %2228  ;;  %v1350_v42 = vsel %vm1333_vm6, %v2220_v30, %v2215_v9  ;;  %v1351_v6 = vsel %vm1333_vm6, %v2221_v15, %v2216_v54 }
 0x11f   :  { %v1371_v56 = vpack.c.bf16 %v1335_v58, %v1334_v50  ;;  %v2231_v2 = vunpack.i.h.bf16 %v2229_v47  ;;  %v2230_v26 = vunpack.i.l.bf16 %v2229_v47  ;;  %v2224_v55 = vpop.permute.xlu0 %2223  ;;  %v1372_v45 = vpack.c.bf16 %v1351_v6, %v1350_v42  ;;  %1250 = vmatprep.mubr.bf16.mxu0 %v2494_v5 }
 0x120   :  { %v2226_v4 = vunpack.i.h.bf16 %v2224_v55  ;;  %v2225_v40 = vunpack.i.l.bf16 %v2224_v55 }
 0x121   :  { %1399 = vmatprep.subr.bf16.mxu0 %v1372_v45  ;;  %584 = vmatmul.mubr.bf16.gmra.mrb[4].mxu1 %v2452_v43 }
 0x122   :  { %v686_v16 = vsel %vm666_vm5, %v2231_v2, %v2226_v4  ;;  %v685_v25 = vsel %vm666_vm5, %v2230_v26, %v2225_v40  ;;  %1400 = vmatpush1.bf16.msra.mxu0 %v1371_v56  ;;  %v2239_v61 = vpop.permute.xlu1 %2238  ;;  %v669_v28 = vsel %vm666_vm5, %v2225_v40, %v2230_v26  ;;  %v670_v7 = vsel %vm666_vm5, %v2226_v4, %v2231_v2 }
 0x123   :  { %v706_v11 = vpack.c.bf16 %v686_v16, %v685_v25  ;;  %v2241_v60 = vunpack.i.h.bf16 %v2239_v61  ;;  %v2240_v20 = vunpack.i.l.bf16 %v2239_v61  ;;  %v2234_v13 = vpop.permute.xlu0 %2233  ;;  %v707_v44 = vpack.c.bf16 %v670_v7, %v669_v28  ;;  %764 = vmatprep.mubr.bf16.mxu1 %v2494_v5 }
 0x124   :  { %v2236_v36 = vunpack.i.h.bf16 %v2234_v13  ;;  %v2235_v8 = vunpack.i.l.bf16 %v2234_v13 }
 0x125   :  { %734 = vmatprep.subr.bf16.mxu1 %v707_v44  ;;  %1251 = vmatmul.mubr.bf16.gmra.mrb[4].mxu0 %v2453_v62 }
 0x126   :  { %v1337_v37 = vsel %vm1333_vm6, %v2236_v36, %v2241_v60  ;;  %v1336_v59 = vsel %vm1333_vm6, %v2235_v8, %v2240_v20  ;;  %735 = vmatpush1.bf16.msra.mxu1 %v706_v11  ;;  %v2249_v21 = vpop.permute.xlu1 %2248  ;;  %v1352_v41 = vsel %vm1333_vm6, %v2240_v20, %v2235_v8  ;;  %v1353_v14 = vsel %vm1333_vm6, %v2241_v60, %v2236_v36 }
 0x127   :  { %v1373_v0 = vpack.c.bf16 %v1337_v37, %v1336_v59  ;;  %v2251_v19 = vunpack.i.h.bf16 %v2249_v21  ;;  %v2250_v57 = vunpack.i.l.bf16 %v2249_v21  ;;  %v2244_v39 = vpop.permute.xlu0 %2243  ;;  %v1374_v17 = vpack.c.bf16 %v1353_v14, %v1352_v41  ;;  %1431 = vmatprep.mubr.bf16.mxu0 %v2494_v5 }
 0x128   :  { %v2246_v24 = vunpack.i.h.bf16 %v2244_v39  ;;  %v2245_v51 = vunpack.i.l.bf16 %v2244_v39 }
 0x129   :  { %1401 = vmatprep.subr.bf16.mxu0 %v1374_v17 }
 0x12a   :  { %v688_v3 = vsel %vm666_vm5, %v2251_v19, %v2246_v24  ;;  %v687_v53 = vsel %vm666_vm5, %v2250_v57, %v2245_v51  ;;  %1402 = vmatpush1.bf16.msra.mxu0 %v1373_v0  ;;  %v2259_v48 = vpop.permute.xlu1 %2258  ;;  %v671_v38 = vsel %vm666_vm5, %v2245_v51, %v2250_v57  ;;  %v672_v29 = vsel %vm666_vm5, %v2246_v24, %v2251_v19 }
 0x12b   :  { %v708_v52 = vpack.c.bf16 %v688_v3, %v687_v53  ;;  %v2261_v33 = vunpack.i.h.bf16 %v2259_v48  ;;  %v2260_v63 = vunpack.i.l.bf16 %v2259_v48  ;;  %v2254_v34 = vpop.permute.xlu0 %2253  ;;  %v709_v12 = vpack.c.bf16 %v672_v29, %v671_v38 }
 0x12c   :  { %v2256_v27 = vunpack.i.h.bf16 %v2254_v34  ;;  %v2255_v49 = vunpack.i.l.bf16 %v2254_v34 }
 0x12d   :  { %736 = vmatprep.subr.bf16.mxu1 %v709_v12 }
 0x12e   :  { %v1339_v18 = vsel %vm1333_vm6, %v2256_v27, %v2261_v33  ;;  %v1338_v32 = vsel %vm1333_vm6, %v2255_v49, %v2260_v63  ;;  %737 = vmatpush1.bf16.msra.mxu1 %v708_v52  ;;  %v2269_v35 = vpop.permute.xlu1 %2268  ;;  %v1354_v10 = vsel %vm1333_vm6, %v2260_v63, %v2255_v49  ;;  %v1355_v23 = vsel %vm1333_vm6, %v2261_v33, %v2256_v27 }
 0x12f   :  { %v1375_v22 = vpack.c.bf16 %v1339_v18, %v1338_v32  ;;  %v2271_v15 = vunpack.i.h.bf16 %v2269_v35  ;;  %v2270_v30 = vunpack.i.l.bf16 %v2269_v35  ;;  %v2264_v1 = vpop.permute.xlu0 %2263  ;;  %v1376_v46 = vpack.c.bf16 %v1355_v23, %v1354_v10 }
 0x130   :  { %v2266_v54 = vunpack.i.h.bf16 %v2264_v1  ;;  %v2265_v9 = vunpack.i.l.bf16 %v2264_v1 }
 0x131   :  { %1403 = vmatprep.subr.bf16.mxu0 %v1376_v46 }
 0x132   :  { %v690_v43 = vsel %vm666_vm5, %v2271_v15, %v2266_v54  ;;  %v689_v58 = vsel %vm666_vm5, %v2270_v30, %v2265_v9  ;;  %1404 = vmatpush1.bf16.msra.mxu0 %v1375_v22  ;;  %v2279_v50 = vpop.permute.xlu1 %2278  ;;  %v673_v47 = vsel %vm666_vm5, %v2265_v9, %v2270_v30  ;;  %v674_v42 = vsel %vm666_vm5, %v2266_v54, %v2271_v15 }
 0x133   :  { %v710_v6 = vpack.c.bf16 %v690_v43, %v689_v58  ;;  %v2281_v56 = vunpack.i.h.bf16 %v2279_v50  ;;  %v2280_v2 = vunpack.i.l.bf16 %v2279_v50  ;;  %v2274_v26 = vpop.permute.xlu0 %2273  ;;  %v711_v55 = vpack.c.bf16 %v674_v42, %v673_v47 }
 0x134   :  { %v2276_v45 = vunpack.i.h.bf16 %v2274_v26  ;;  %v2275_v4 = vunpack.i.l.bf16 %v2274_v26 }
 0x135   :  { %738 = vmatprep.subr.bf16.mxu1 %v711_v55 }
 0x136   :  { %v1341_v40 = vsel %vm1333_vm6, %v2276_v45, %v2281_v56  ;;  %v1340_v62 = vsel %vm1333_vm6, %v2275_v4, %v2280_v2  ;;  %739 = vmatpush1.bf16.msra.mxu1 %v710_v6  ;;  %v2289_v16 = vpop.permute.xlu1 %2288  ;;  %v1356_v25 = vsel %vm1333_vm6, %v2280_v2, %v2275_v4  ;;  %v1357_v61 = vsel %vm1333_vm6, %v2281_v56, %v2276_v45 }
 0x137   :  { %v1377_v28 = vpack.c.bf16 %v1341_v40, %v1340_v62  ;;  %v2291_v7 = vunpack.i.h.bf16 %v2289_v16  ;;  %v2290_v11 = vunpack.i.l.bf16 %v2289_v16  ;;  %v2284_v60 = vpop.permute.xlu0 %2283  ;;  %v1378_v20 = vpack.c.bf16 %v1357_v61, %v1356_v25 }
 0x138   :  { %v2286_v13 = vunpack.i.h.bf16 %v2284_v60  ;;  %v2285_v44 = vunpack.i.l.bf16 %v2284_v60 }
 0x139   :  { %1405 = vmatprep.subr.bf16.mxu0 %v1378_v20 }
 0x13a   :  { %v692_v36 = vsel %vm666_vm5, %v2291_v7, %v2286_v13  ;;  %v691_v8 = vsel %vm666_vm5, %v2290_v11, %v2285_v44  ;;  %1406 = vmatpush1.bf16.msra.mxu0 %v1377_v28  ;;  %v2299_v37 = vpop.permute.xlu1 %2298  ;;  %v675_v59 = vsel %vm666_vm5, %v2285_v44, %v2290_v11  ;;  %v676_v21 = vsel %vm666_vm5, %v2286_v13, %v2291_v7 }
 0x13b   :  { %v712_v41 = vpack.c.bf16 %v692_v36, %v691_v8  ;;  %v2301_v14 = vunpack.i.h.bf16 %v2299_v37  ;;  %v2300_v0 = vunpack.i.l.bf16 %v2299_v37  ;;  %v2294_v19 = vpop.permute.xlu0 %2293  ;;  %v713_v57 = vpack.c.bf16 %v676_v21, %v675_v59 }
 0x13c   :  { %v2296_v39 = vunpack.i.h.bf16 %v2294_v19  ;;  %v2295_v17 = vunpack.i.l.bf16 %v2294_v19 }
 0x13d   :  { %740 = vmatprep.subr.bf16.mxu1 %v713_v57 }
 0x13e   :  { %v1343_v24 = vsel %vm1333_vm6, %v2296_v39, %v2301_v14  ;;  %v1342_v51 = vsel %vm1333_vm6, %v2295_v17, %v2300_v0  ;;  %741 = vmatpush1.bf16.msra.mxu1 %v712_v41  ;;  %v2309_v3 = vpop.permute.xlu1 %2308  ;;  %v1358_v53 = vsel %vm1333_vm6, %v2300_v0, %v2295_v17  ;;  %v1359_v48 = vsel %vm1333_vm6, %v2301_v14, %v2296_v39 }
 0x13f   :  { %v1379_v38 = vpack.c.bf16 %v1343_v24, %v1342_v51  ;;  %v2311_v29 = vunpack.i.h.bf16 %v2309_v3  ;;  %v2310_v52 = vunpack.i.l.bf16 %v2309_v3  ;;  %v2304_v33 = vpop.permute.xlu0 %2303  ;;  %v1380_v63 = vpack.c.bf16 %v1359_v48, %v1358_v53 }
 0x140   :  { %v2306_v34 = vunpack.i.h.bf16 %v2304_v33  ;;  %v2305_v12 = vunpack.i.l.bf16 %v2304_v33 }
 0x141   :  { %1407 = vmatprep.subr.bf16.mxu0 %v1380_v63 }
 0x142   :  { %v694_v27 = vsel %vm666_vm5, %v2311_v29, %v2306_v34  ;;  %v693_v49 = vsel %vm666_vm5, %v2310_v52, %v2305_v12  ;;  %1408 = vmatpush1.bf16.msra.mxu0 %v1379_v38  ;;  %v2319_v18 = vpop.permute.xlu1 %2318  ;;  %v677_v32 = vsel %vm666_vm5, %v2305_v12, %v2310_v52  ;;  %v678_v35 = vsel %vm666_vm5, %v2306_v34, %v2311_v29  ;;  %v2454_v34 = vld [vmem:[%s3848_s1 + $0x30] sm:$0xff]  }
 0x143   :  { %v714_v10 = vpack.c.bf16 %v694_v27, %v693_v49  ;;  %v2321_v23 = vunpack.i.h.bf16 %v2319_v18  ;;  %v2320_v22 = vunpack.i.l.bf16 %v2319_v18  ;;  %v2314_v15 = vpop.permute.xlu0 %2313  ;;  %v715_v30 = vpack.c.bf16 %v678_v35, %v677_v32 }
 0x144   :  { %v2316_v1 = vunpack.i.h.bf16 %v2314_v15  ;;  %v2315_v46 = vunpack.i.l.bf16 %v2314_v15 }
 0x145   :  { %742 = vmatprep.subr.bf16.mxu1 %v715_v30 }
 0x146   :  { %v1345_v54 = vsel %vm1333_vm6, %v2316_v1, %v2321_v23  ;;  %v1344_v9 = vsel %vm1333_vm6, %v2315_v46, %v2320_v22  ;;  %743 = vmatpush1.bf16.msra.mxu1 %v714_v10  ;;  %v2329_v43 = vpop.permute.xlu1 %2328  ;;  %v1360_v58 = vsel %vm1333_vm6, %v2320_v22, %v2315_v46  ;;  %v1361_v50 = vsel %vm1333_vm6, %v2321_v23, %v2316_v1  ;;  %v2455_v46 = vld [vmem:[%s3848_s1 + $0x70] sm:$0xff]  }
 0x147   :  { %v1381_v47 = vpack.c.bf16 %v1345_v54, %v1344_v9  ;;  %v2331_v42 = vunpack.i.h.bf16 %v2329_v43  ;;  %v2330_v6 = vunpack.i.l.bf16 %v2329_v43  ;;  %v2324_v56 = vpop.permute.xlu0 %2323  ;;  %v1382_v2 = vpack.c.bf16 %v1361_v50, %v1360_v58 }
 0x148   :  { %v2326_v26 = vunpack.i.h.bf16 %v2324_v56  ;;  %v2325_v55 = vunpack.i.l.bf16 %v2324_v56 }
 0x149   :  { %1409 = vmatprep.subr.bf16.mxu0 %v1382_v2 }
 0x14a   :  { %v696_v45 = vsel %vm666_vm5, %v2331_v42, %v2326_v26  ;;  %v695_v4 = vsel %vm666_vm5, %v2330_v6, %v2325_v55  ;;  %1410 = vmatpush1.bf16.msra.mxu0 %v1381_v47  ;;  %v2339_v40 = vpop.permute.xlu1 %2338  ;;  %v679_v62 = vsel %vm666_vm5, %v2325_v55, %v2330_v6  ;;  %v680_v16 = vsel %vm666_vm5, %v2326_v26, %v2331_v42 }
 0x14b   :  { %v716_v25 = vpack.c.bf16 %v696_v45, %v695_v4  ;;  %v2341_v61 = vunpack.i.h.bf16 %v2339_v40  ;;  %v2340_v28 = vunpack.i.l.bf16 %v2339_v40  ;;  %v2334_v7 = vpop.permute.xlu0 %2333  ;;  %v717_v11 = vpack.c.bf16 %v680_v16, %v679_v62  ;;  %v2456_v45 = vld [vmem:[%s3848_s1 + $0x38] sm:$0xff]  }
 0x14c   :  { %v2336_v60 = vunpack.i.h.bf16 %v2334_v7  ;;  %v2335_v20 = vunpack.i.l.bf16 %v2334_v7 }
 0x14d   :  { %744 = vmatprep.subr.bf16.mxu1 %v717_v11 }
 0x14e   :  { %v1347_v13 = vsel %vm1333_vm6, %v2336_v60, %v2341_v61  ;;  %v1346_v44 = vsel %vm1333_vm6, %v2335_v20, %v2340_v28  ;;  %745 = vmatpush1.bf16.msra.mxu1 %v716_v25  ;;  %v2349_v36 = vpop.permute.xlu1 %2348  ;;  %v1362_v8 = vsel %vm1333_vm6, %v2340_v28, %v2335_v20  ;;  %v1363_v37 = vsel %vm1333_vm6, %v2341_v61, %v2336_v60 }
 0x14f   :  { %v1383_v59 = vpack.c.bf16 %v1347_v13, %v1346_v44  ;;  %v2351_v21 = vunpack.i.h.bf16 %v2349_v36  ;;  %v2350_v41 = vunpack.i.l.bf16 %v2349_v36  ;;  %v2344_v14 = vpop.permute.xlu0 %2343  ;;  %v1384_v0 = vpack.c.bf16 %v1363_v37, %v1362_v8  ;;  %v2457_v44 = vld [vmem:[%s3848_s1 + $0x78] sm:$0xff]  }
 0x150   :  { %v2346_v19 = vunpack.i.h.bf16 %v2344_v14  ;;  %v2345_v57 = vunpack.i.l.bf16 %v2344_v14 }
 0x151   :  { %1411 = vmatprep.subr.bf16.mxu0 %v1384_v0 }
 0x152   :  { %v698_v39 = vsel %vm666_vm5, %v2351_v21, %v2346_v19  ;;  %v697_v17 = vsel %vm666_vm5, %v2350_v41, %v2345_v57  ;;  %1412 = vmatpush1.bf16.msra.mxu0 %v1383_v59  ;;  %v2359_v24 = vpop.permute.xlu1 %2358  ;;  %v681_v51 = vsel %vm666_vm5, %v2345_v57, %v2350_v41  ;;  %v682_v3 = vsel %vm666_vm5, %v2346_v19, %v2351_v21 }
 0x153   :  { %v718_v53 = vpack.c.bf16 %v698_v39, %v697_v17  ;;  %v2361_v48 = vunpack.i.h.bf16 %v2359_v24  ;;  %v2360_v38 = vunpack.i.l.bf16 %v2359_v24  ;;  %v2354_v29 = vpop.permute.xlu0 %2353  ;;  %v719_v52 = vpack.c.bf16 %v682_v3, %v681_v51 }
 0x154   :  { %v2356_v33 = vunpack.i.h.bf16 %v2354_v29  ;;  %v2355_v63 = vunpack.i.l.bf16 %v2354_v29 }
 0x155   :  { %746 = vmatprep.subr.bf16.mxu1 %v719_v52 }
 0x156   :  { %v1349_v12 = vsel %vm1333_vm6, %v2356_v33, %v2361_v48  ;;  %v1348_v27 = vsel %vm1333_vm6, %v2355_v63, %v2360_v38  ;;  %747 = vmatpush1.bf16.msra.mxu1 %v718_v53  ;;  %v2369_v49 = vpop.permute.xlu1 %2368  ;;  %v1364_v18 = vsel %vm1333_vm6, %v2360_v38, %v2355_v63  ;;  %v1365_v32 = vsel %vm1333_vm6, %v2361_v48, %v2356_v33 }
 0x157   :  { %v1385_v35 = vpack.c.bf16 %v1349_v12, %v1348_v27  ;;  %v2371_v10 = vunpack.i.h.bf16 %v2369_v49  ;;  %v2370_v23 = vunpack.i.l.bf16 %v2369_v49  ;;  %v2364_v22 = vpop.permute.xlu0 %2363  ;;  %v1386_v15 = vpack.c.bf16 %v1365_v32, %v1364_v18 }
 0x158   :  { %v2366_v30 = vunpack.i.h.bf16 %v2364_v22  ;;  %v2365_v1 = vunpack.i.l.bf16 %v2364_v22 }
 0x159   :  { %765 = vmatmul.mubr.bf16.vlgmr.msra.gmra.mrb[0].mxu1 %v2454_v34  ;;  %1413 = vmatprep.subr.bf16.mxu0 %v1386_v15 }
 0x15a   :  { %v1526_v54 = vsel %vm1524_vm7, %v2366_v30, %v2371_v10  ;;  %v1525_v9 = vsel %vm1524_vm7, %v2365_v1, %v2370_v23  ;;  %1414 = vmatpush1.bf16.msra.mxu0 %v1385_v35  ;;  %v2379_v43 = vpop.permute.xlu1 %2378  ;;  %v1541_v58 = vsel %vm1524_vm7, %v2370_v23, %v2365_v1  ;;  %v1542_v50 = vsel %vm1524_vm7, %v2371_v10, %v2366_v30 }
 0x15b   :  { %v1562_v47 = vpack.c.bf16 %v1526_v54, %v1525_v9  ;;  %v2381_v42 = vunpack.i.h.bf16 %v2379_v43  ;;  %v2380_v6 = vunpack.i.l.bf16 %v2379_v43  ;;  %v2374_v56 = vpop.permute.xlu0 %2373  ;;  %v1563_v2 = vpack.c.bf16 %v1542_v50, %v1541_v58  ;;  %774 = vmatprep.mubr.bf16.mxu1 %v2494_v5 }
 0x15c   :  { %v2376_v26 = vunpack.i.h.bf16 %v2374_v56  ;;  %v2375_v55 = vunpack.i.l.bf16 %v2374_v56 }
 0x15d   :  { %1432 = vmatmul.mubr.bf16.vlgmr.msra.gmra.mrb[0].mxu0 %v2455_v46  ;;  %1590 = vmatprep.subr.bf16.mxu0 %v1563_v2 }
 0x15e   :  { %v1528_v4 = vsel %vm1524_vm7, %v2376_v26, %v2381_v42  ;;  %v1527_v40 = vsel %vm1524_vm7, %v2375_v55, %v2380_v6  ;;  %1713 = vmatprep.subr.bf16.mxu1 %v1563_v2  ;;  %1591 = vmatpush1.bf16.msra.mxu0 %v1562_v47  ;;  %v2389_v62 = vpop.permute.xlu1 %2388  ;;  %v1543_v16 = vsel %vm1524_vm7, %v2380_v6, %v2375_v55 }
 0x15f   :  { %v1564_v25 = vpack.c.bf16 %v1528_v4, %v1527_v40  ;;  %1721 = vmatpush1.bf16.msra.mxu1 %v1562_v47  ;;  %v2391_v61 = vunpack.i.h.bf16 %v2389_v62  ;;  %v2390_v28 = vunpack.i.l.bf16 %v2389_v62  ;;  %v2384_v7 = vpop.permute.xlu0 %2383  ;;  %v1544_v11 = vsel %vm1524_vm7, %v2381_v42, %v2376_v26  ;;  %1441 = vmatprep.mubr.bf16.mxu0 %v2494_v5 }
 0x160   :  { %v2386_v60 = vunpack.i.h.bf16 %v2384_v7  ;;  %v2385_v20 = vunpack.i.l.bf16 %v2384_v7  ;;  %v1565_v13 = vpack.c.bf16 %v1544_v11, %v1543_v16 }
 0x161   :  { %775 = vmatmul.mubr.bf16.gmra.mrb[4].mxu1 %v2456_v45 }
 0x162   :  { %v1530_v36 = vsel %vm1524_vm7, %v2386_v60, %v2391_v61  ;;  %v1529_v8 = vsel %vm1524_vm7, %v2385_v20, %v2390_v28  ;;  %1592 = vmatprep.subr.bf16.mxu0 %v1565_v13  ;;  %1714 = vmatprep.subr.bf16.mxu1 %v1565_v13  ;;  %v2399_v37 = vpop.permute.xlu1 %2398  ;;  %v1545_v59 = vsel %vm1524_vm7, %v2390_v28, %v2385_v20 }
 0x163   :  { %v1566_v21 = vpack.c.bf16 %v1530_v36, %v1529_v8  ;;  %1593 = vmatpush1.bf16.msra.mxu0 %v1564_v25  ;;  %1722 = vmatpush1.bf16.msra.mxu1 %v1564_v25  ;;  %v2401_v41 = vunpack.i.h.bf16 %v2399_v37  ;;  %v2400_v14 = vunpack.i.l.bf16 %v2399_v37  ;;  %v2394_v0 = vpop.permute.xlu0 %2393  ;;  %v1546_v19 = vsel %vm1524_vm7, %v2391_v61, %v2386_v60 }
 0x164   :  { %v2396_v57 = vunpack.i.h.bf16 %v2394_v0  ;;  %v2395_v39 = vunpack.i.l.bf16 %v2394_v0  ;;  %v1567_v17 = vpack.c.bf16 %v1546_v19, %v1545_v59  ;;  %1632 = vmatprep.mubr.bf16.mxu1 %v2494_v5  ;;  %v2458_v59 = vld [vmem:[%s3848_s1 + $0x80] sm:$0xff]  }
 0x165   :  { %1442 = vmatmul.mubr.bf16.gmra.mrb[4].mxu0 %v2457_v44 }
 0x166   :  { %v1532_v24 = vsel %vm1524_vm7, %v2396_v57, %v2401_v41  ;;  %v1531_v51 = vsel %vm1524_vm7, %v2395_v39, %v2400_v14  ;;  %1594 = vmatprep.subr.bf16.mxu0 %v1567_v17  ;;  %1715 = vmatprep.subr.bf16.mxu1 %v1567_v17  ;;  %v2409_v3 = vpop.permute.xlu1 %2408  ;;  %v1547_v53 = vsel %vm1524_vm7, %v2400_v14, %v2395_v39 }
 0x167   :  { %v1568_v48 = vpack.c.bf16 %v1532_v24, %v1531_v51  ;;  %1595 = vmatpush1.bf16.msra.mxu0 %v1566_v21  ;;  %1723 = vmatpush1.bf16.msra.mxu1 %v1566_v21  ;;  %v2411_v38 = vunpack.i.h.bf16 %v2409_v3  ;;  %v2410_v29 = vunpack.i.l.bf16 %v2409_v3  ;;  %v2404_v52 = vpop.permute.xlu0 %2403  ;;  %v1548_v33 = vsel %vm1524_vm7, %v2401_v41, %v2396_v57  ;;  %v2459_v21 = vld [vmem:[%s3848_s1 + $0x88] sm:$0xff]  }
 0x168   :  { %v2406_v63 = vunpack.i.h.bf16 %v2404_v52  ;;  %v2405_v34 = vunpack.i.l.bf16 %v2404_v52  ;;  %v1569_v12 = vpack.c.bf16 %v1548_v33, %v1547_v53  ;;  %1622 = vmatprep.mubr.bf16.mxu0 %v2494_v5 }
 0x16a   :  { %v1534_v27 = vsel %vm1524_vm7, %v2406_v63, %v2411_v38  ;;  %v1533_v49 = vsel %vm1524_vm7, %v2405_v34, %v2410_v29  ;;  %1596 = vmatprep.subr.bf16.mxu0 %v1569_v12  ;;  %1716 = vmatprep.subr.bf16.mxu1 %v1569_v12  ;;  %v2419_v18 = vpop.permute.xlu1 %2418  ;;  %v1549_v32 = vsel %vm1524_vm7, %v2410_v29, %v2405_v34 }
 0x16b   :  { %v1570_v35 = vpack.c.bf16 %v1534_v27, %v1533_v49  ;;  %1597 = vmatpush1.bf16.msra.mxu0 %v1568_v48  ;;  %1724 = vmatpush1.bf16.msra.mxu1 %v1568_v48  ;;  %v2421_v10 = vunpack.i.h.bf16 %v2419_v18  ;;  %v2420_v23 = vunpack.i.l.bf16 %v2419_v18  ;;  %v2414_v22 = vpop.permute.xlu0 %2413  ;;  %v1550_v5 = vsel %vm1524_vm7, %v2411_v38, %v2406_v63 }
 0x16c   :  { %v2416_v15 = vunpack.i.h.bf16 %v2414_v22  ;;  %v2415_v30 = vunpack.i.l.bf16 %v2414_v22  ;;  %v1571_v1 = vpack.c.bf16 %v1550_v5, %v1549_v32 }
 0x16e   :  { %v1536_v46 = vsel %vm1524_vm7, %v2416_v15, %v2421_v10  ;;  %v1535_v54 = vsel %vm1524_vm7, %v2415_v30, %v2420_v23  ;;  %1598 = vmatprep.subr.bf16.mxu0 %v1571_v1  ;;  %1717 = vmatprep.subr.bf16.mxu1 %v1571_v1  ;;  %v2429_v9 = vpop.permute.xlu1 %2428  ;;  %v1551_v43 = vsel %vm1524_vm7, %v2420_v23, %v2415_v30 }
 0x16f   :  { %v1572_v58 = vpack.c.bf16 %v1536_v46, %v1535_v54  ;;  %1599 = vmatpush1.bf16.msra.mxu0 %v1570_v35  ;;  %1725 = vmatpush1.bf16.msra.mxu1 %v1570_v35  ;;  %v2431_v50 = vunpack.i.h.bf16 %v2429_v9  ;;  %v2430_v47 = vunpack.i.l.bf16 %v2429_v9  ;;  %v2424_v42 = vpop.permute.xlu0 %2423  ;;  %v1552_v6 = vsel %vm1524_vm7, %v2421_v10, %v2416_v15 }
 0x170   :  { %v2426_v56 = vunpack.i.h.bf16 %v2424_v42  ;;  %v2425_v2 = vunpack.i.l.bf16 %v2424_v42  ;;  %v1573_v26 = vpack.c.bf16 %v1552_v6, %v1551_v43 }
 0x172   :  { %v1538_v55 = vsel %vm1524_vm7, %v2426_v56, %v2431_v50  ;;  %v1537_v45 = vsel %vm1524_vm7, %v2425_v2, %v2430_v47  ;;  %1600 = vmatprep.subr.bf16.mxu0 %v1573_v26  ;;  %1718 = vmatprep.subr.bf16.mxu1 %v1573_v26  ;;  %v2439_v4 = vpop.permute.xlu1 %2438  ;;  %v1553_v40 = vsel %vm1524_vm7, %v2430_v47, %v2425_v2 }
 0x173   :  { %v1574_v62 = vpack.c.bf16 %v1538_v55, %v1537_v45  ;;  %1601 = vmatpush1.bf16.msra.mxu0 %v1572_v58  ;;  %1726 = vmatpush1.bf16.msra.mxu1 %v1572_v58  ;;  %v2441_v16 = vunpack.i.h.bf16 %v2439_v4  ;;  %v2440_v25 = vunpack.i.l.bf16 %v2439_v4  ;;  %v2434_v61 = vpop.permute.xlu0 %2433  ;;  %v1554_v28 = vsel %vm1524_vm7, %v2431_v50, %v2426_v56 }
 0x174   :  { %v2436_v7 = vunpack.i.h.bf16 %v2434_v61  ;;  %v2435_v11 = vunpack.i.l.bf16 %v2434_v61  ;;  %v1575_v60 = vpack.c.bf16 %v1554_v28, %v1553_v40 }
 0x176   :  { %v1540_v20 = vsel %vm1524_vm7, %v2436_v7, %v2441_v16  ;;  %v1539_v13 = vsel %vm1524_vm7, %v2435_v11, %v2440_v25  ;;  %1602 = vmatprep.subr.bf16.mxu0 %v1575_v60  ;;  %1719 = vmatprep.subr.bf16.mxu1 %v1575_v60  ;;  %v1555_v44 = vsel %vm1524_vm7, %v2440_v25, %v2435_v11 }
 0x177   :  { %v1576_v36 = vpack.c.bf16 %v1540_v20, %v1539_v13  ;;  %1603 = vmatpush1.bf16.msra.mxu0 %v1574_v62  ;;  %1727 = vmatpush1.bf16.msra.mxu1 %v1574_v62  ;;  %v1556_v8 = vsel %vm1524_vm7, %v2441_v16, %v2436_v7 }
 0x178   :  { %v1577_v37 = vpack.c.bf16 %v1556_v8, %v1555_v44 }
 0x17a   :  { %1604 = vmatprep.subr.bf16.mxu0 %v1577_v37  ;;  %1720 = vmatprep.subr.bf16.mxu1 %v1577_v37 }
 0x17b   :  { %1605 = vmatpush1.bf16.msra.mxu0 %v1576_v36  ;;  %1728 = vmatpush1.bf16.msra.mxu1 %v1576_v36 }
 0x17e   :  { %1623 = vmatmul.mubr.bf16.vlgmr.msra.gmra.mrb[0].mxu0 %v2458_v59  ;;  %1633 = vmatmul.mubr.bf16.vlgmr.msra.gmra.mrb[8].mxu1 %v2459_v21 }
 0x22c   :  { %v766_v41 = vpop.f32.mrb[0].mxu1 }
 0x22d   :  { %v768_v14 = vpop.f32.mrb[1].mxu1 }
 0x22e   :  { %v770_v0 = vpop.f32.mrb[2].mxu1 }
 0x22f   :  { %v772_v31 = vpop.f32.mrb[3].mxu1 }
 0x234   :  { %v776_v19 = vpop.f32.mrb[4].mxu1 }
 0x235   :  { %v778_v57 = vpop.f32.mrb[5].mxu1 }
 0x236   :  { %v780_v39 = vpop.f32.mrb[6].mxu1 }
 0x237   :  { %v782_v17 = vpop.f32.mrb[7].mxu1 }
 0x238   :  { %v1443_v24 = vpop.f32.mrb[4].mxu0 }
 0x239   :  { %v1733_v51 = vadd.f32 %v1443_v24, %v776_v19  ;;  %v1445_v3 = vpop.f32.mrb[5].mxu0 }
 0x23a   :  { %v1735_v53 = vadd.f32 %v1445_v3, %v778_v57  ;;  %v1447_v48 = vpop.f32.mrb[6].mxu0 }
 0x23b   :  { %v1737_v38 = vadd.f32 %v1447_v48, %v780_v39  ;;  %v1449_v29 = vpop.f32.mrb[7].mxu0 }
 0x23c   :  { %v1739_v52 = vadd.f32 %v1449_v29, %v782_v17 }
 0x251   :  { %v1624_v33 = vpop.f32.mrb[0].mxu0  ;;  %v1634_v63 = vpop.f32.mrb[8].mxu1 }
 0x252   :  { %v1729_v34 = vadd.f32 %v1624_v33, %v766_v41  ;;  %v1734_v12 = vadd.f32 %v1733_v51, %v1634_v63  ;;  %v1626_v27 = vpop.f32.mrb[1].mxu0  ;;  %v1636_v49 = vpop.f32.mrb[9].mxu1 }
 0x253   :  { %v1730_v18 = vadd.f32 %v1626_v27, %v768_v14  ;;  %v1736_v32 = vadd.f32 %v1735_v53, %v1636_v49  ;;  %v1628_v35 = vpop.f32.mrb[2].mxu0  ;;  %v1638_v10 = vpop.f32.mrb[10].mxu1 }
 0x254   :  { %1651 = vst [vmem:[%s3849_s2] sm:$0xff] %v1729_v34  ;;  %1655 = vst [vmem:[%s3849_s2 + $0x20] sm:$0xff] %v1734_v12  ;;  %v1731_v23 = vadd.f32 %v1628_v35, %v770_v0  ;;  %v1738_v22 = vadd.f32 %v1737_v38, %v1638_v10  ;;  %v1630_v5 = vpop.f32.mrb[3].mxu0  ;;  %v1640_v15 = vpop.f32.mrb[11].mxu1 }
 0x255   :  { %1652 = vst [vmem:[%s3849_s2 + $0x8] sm:$0xff] %v1730_v18  ;;  %1656 = vst [vmem:[%s3849_s2 + $0x28] sm:$0xff] %v1736_v32  ;;  %v1732_v30 = vadd.f32 %v1630_v5, %v772_v31  ;;  %v1740_v1 = vadd.f32 %v1739_v52, %v1640_v15 }
 0x256   :  { %1653 = vst [vmem:[%s3849_s2 + $0x10] sm:$0xff] %v1731_v23  ;;  %1657 = vst [vmem:[%s3849_s2 + $0x30] sm:$0xff] %v1738_v22 }
 0x257   :  { %1654 = vst [vmem:[%s3849_s2 + $0x18] sm:$0xff] %v1732_v30  ;;  %1658 = vst [vmem:[%s3849_s2 + $0x38] sm:$0xff] %v1740_v1 }

</bundles_post_ra>
